<compile_context>
chip_gen: v5e
topology: v5e:2x2
jax: 0.10.0
libtpu: 0.0.40
codegen_flags: <defaults>
</compile_context>

<pallas_src>
import jax
import jax.numpy as jnp
from jax.experimental import pallas as pl
from jax.experimental.pallas import tpu as pltpu

LANE = 128
BF16_SUBLANE = 16


def _round_up(x, m):
    return ((x + m - 1) // m) * m


# ----------------------------- Pallas kernel ---------------------------------
def fused_head_kernel(mean_ref, wp_ref, bp_ref, w1_ref, b1_ref, w2_ref, b2_ref, out_ref):
    # mean: [TB, 768] bf16 | wp: [768, 768] bf16 | bp: [1, 768] f32
    # w1:   [768, Hp] bf16 | b1: [1, Hp]  f32
    # w2:   [Hp, Cp]  bf16 | b2: [1, Cp]  f32
    # out:  [TB, Cp]  f32  (lane-dense, padded C)
    pooled = jnp.tanh(
        jnp.dot(mean_ref[...], wp_ref[...], preferred_element_type=jnp.float32)
        + bp_ref[...]
    )
    h = jnp.dot(pooled.astype(jnp.bfloat16), w1_ref[...],
                preferred_element_type=jnp.float32) + b1_ref[...]
    h = jnp.maximum(h, 0.0)                                   # ReLU
    out_ref[...] = jnp.dot(h.astype(jnp.bfloat16), w2_ref[...],
                           preferred_element_type=jnp.float32) + b2_ref[...]


def neural_net_head(mean, wp, bp, w1, b1, w2, b2):
    """Fused pooler-dense -> tanh -> Linear(768,H) -> ReLU -> Linear(H,C) on the MXU."""
    B, D = mean.shape
    H = w1.shape[1]
    C = w2.shape[1]

    H_pad = _round_up(max(H, LANE), LANE)
    C_pad = _round_up(max(C, LANE), LANE)

    # Batch tiling: one full (sublane-padded) tile for small B, 256-row tiles otherwise.
    tile_b = min(256, _round_up(B, BF16_SUBLANE))
    B_pad = _round_up(B, tile_b)

    # bf16 operands (halve weight DMA bytes, native MXU rate); biases stay f32.
    mean_p = jnp.zeros((B_pad, D), jnp.bfloat16).at[:B].set(mean.astype(jnp.bfloat16))
    wp_b = wp.astype(jnp.bfloat16)
    bp_2d = bp.reshape(1, D).astype(jnp.float32)
    w1_p = jnp.zeros((D, H_pad), jnp.bfloat16).at[:, :H].set(w1.astype(jnp.bfloat16))
    b1_p = jnp.zeros((1, H_pad), jnp.float32).at[:, :H].set(b1.astype(jnp.float32))
    w2_p = jnp.zeros((H_pad, C_pad), jnp.bfloat16).at[:H, :C].set(w2.astype(jnp.bfloat16))
    b2_p = jnp.zeros((1, C_pad), jnp.float32).at[:, :C].set(b2.astype(jnp.float32))

    grid = (B_pad // tile_b,)
    out = pl.pallas_call(
        fused_head_kernel,
        out_shape=jax.ShapeDtypeStruct((B_pad, C_pad), jnp.float32),
        grid_spec=pltpu.PrefetchScalarGridSpec(
            num_scalar_prefetch=0,
            grid=grid,
            in_specs=[
                pl.BlockSpec((tile_b, D), lambda i: (i, 0)),      # mean tile (pipelined)
                pl.BlockSpec((D, D), lambda i: (0, 0)),           # wp (resident)
                pl.BlockSpec((1, D), lambda i: (0, 0)),           # bp (resident)
                pl.BlockSpec((D, H_pad), lambda i: (0, 0)),       # w1 (resident)
                pl.BlockSpec((1, H_pad), lambda i: (0, 0)),       # b1 (resident)
                pl.BlockSpec((H_pad, C_pad), lambda i: (0, 0)),   # w2 (resident)
                pl.BlockSpec((1, C_pad), lambda i: (0, 0)),       # b2 (resident)
            ],
            out_specs=pl.BlockSpec((tile_b, C_pad), lambda i: (i, 0)),
        ),
        compiler_params=pltpu.CompilerParams(
            dimension_semantics=("parallel",),          # shard batch tiles across TCs (v7x)
            vmem_limit_bytes=48 * 1024 * 1024,          # safe under v7x 64 MiB, > v5e default
        ),
    )(mean_p, wp_b, bp_2d, w1_p, b1_p, w2_p, b2_p)
    return out[:B, :C]


# ------------------------ deterministic parameter setup -----------------------
def init_params(key, hidden_size, num_classes, vocab_size=128, bert_dim=768):
    ks = jax.random.split(key, 6)
    params = {
        # surrogate "bert" pieces
        "emb": jax.random.normal(ks[0], (vocab_size, bert_dim), jnp.float32) * 0.02,
        "wp": jax.random.normal(ks[1], (bert_dim, bert_dim), jnp.float32) * (1.0 / jnp.sqrt(bert_dim)),
        "bp": jnp.zeros((bert_dim,), jnp.float32),
        # classification head (matches nn.Linear(768, hidden), nn.Linear(hidden, num_classes))
        "w1": jax.random.normal(ks[2], (bert_dim, hidden_size), jnp.float32) * (1.0 / jnp.sqrt(bert_dim)),
        "b1": jax.random.normal(ks[3], (hidden_size,), jnp.float32) * 0.01,
        "w2": jax.random.normal(ks[4], (hidden_size, num_classes), jnp.float32) * (1.0 / jnp.sqrt(hidden_size)),
        "b2": jax.random.normal(ks[5], (num_classes,), jnp.float32) * 0.01,
    }
    return params


def surrogate_token_mean(params, input_ids, attention_mask):
    """Embedding gather + masked mean pooling (kept in XLA; gather has no clean block map)."""
    tok = params["emb"][input_ids]                              # [B, S, 768]
    mask = attention_mask.astype(jnp.float32)[..., None]        # [B, S, 1]
    summed = jnp.sum(tok * mask, axis=1)                        # [B, 768]
    denom = jnp.clip(jnp.sum(mask, axis=1), 1.0, None)          # [B, 1]
    return summed / denom


def neural_net_forward(params, input_ids, attention_mask):
    mean = surrogate_token_mean(params, input_ids, attention_mask)   # [B, 768]
    # pooler dense + tanh + Linear/ReLU/Linear all fused in one Pallas call
    return neural_net_head(mean, params["wp"], params["bp"],
                           params["w1"], params["b1"], params["w2"], params["b2"])


# ----------------------------------- main -------------------------------------
if __name__ == "__main__":
    B, S = 2, 8
    hidden_size, num_classes = 32, 4

    key = jax.random.PRNGKey(0)
    k_params, k_ids = jax.random.split(key)
    params = init_params(k_params, hidden_size, num_classes)

    input_ids = jax.random.randint(k_ids, (B, S), 0, 128, dtype=jnp.int32)
    attention_mask = jnp.ones((B, S), dtype=jnp.int32)

    out = jax.block_until_ready(neural_net_forward(params, input_ids, attention_mask))

    # pure-JAX f32 reference (kernel uses bf16 operands with f32 accumulation)
    mean = surrogate_token_mean(params, input_ids, attention_mask)
    pooled = jnp.tanh(mean @ params["wp"] + params["bp"])
    ref = jnp.maximum(pooled @ params["w1"] + params["b1"], 0.0) @ params["w2"] + params["b2"]

    assert out.shape == (B, num_classes)
    assert jnp.allclose(out, ref, atol=2e-2, rtol=2e-2)

    print("KERNEL_OK")
</pallas_src>

<mosaic_0001>
module attributes {stable_mosaic.version = 11 : i64} {
  func.func @fused_head_kernel(%arg0: i32, %arg1: memref<16x768xbf16, #tpu.memory_space<vmem>>, %arg2: memref<768x768xbf16, #tpu.memory_space<vmem>>, %arg3: memref<1x768xf32, #tpu.memory_space<vmem>>, %arg4: memref<768x128xbf16, #tpu.memory_space<vmem>>, %arg5: memref<1x128xf32, #tpu.memory_space<vmem>>, %arg6: memref<128x128xbf16, #tpu.memory_space<vmem>>, %arg7: memref<1x128xf32, #tpu.memory_space<vmem>>, %arg8: memref<16x128xf32, #tpu.memory_space<vmem>>) attributes {dimension_semantics = [#tpu.dimension_semantics<parallel>], iteration_bounds = array<i64: 1>, scalar_prefetch = 0 : i64, scratch_operands = 0 : i64, tpu.core_type = #tpu.core_type<tc>, window_params = [{transform_indices = @transform_0, window_bounds = array<i64: 16, 768>}, {pipeline_mode = #tpu.pipeline_mode<synchronous>, transform_indices = @transform_1, window_bounds = array<i64: 768, 768>}, {pipeline_mode = #tpu.pipeline_mode<synchronous>, transform_indices = @transform_2, window_bounds = array<i64: 1, 768>}, {pipeline_mode = #tpu.pipeline_mode<synchronous>, transform_indices = @transform_3, window_bounds = array<i64: 768, 128>}, {pipeline_mode = #tpu.pipeline_mode<synchronous>, transform_indices = @transform_4, window_bounds = array<i64: 1, 128>}, {pipeline_mode = #tpu.pipeline_mode<synchronous>, transform_indices = @transform_5, window_bounds = array<i64: 128, 128>}, {pipeline_mode = #tpu.pipeline_mode<synchronous>, transform_indices = @transform_6, window_bounds = array<i64: 1, 128>}, {transform_indices = @transform_7, window_bounds = array<i64: 16, 128>}]} {
    %c0 = arith.constant 0 : index
    %c0_0 = arith.constant 0 : index
    %0 = vector.load %arg1[%c0, %c0_0] : memref<16x768xbf16, #tpu.memory_space<vmem>>, vector<16x768xbf16>
    %c0_1 = arith.constant 0 : index
    %c0_2 = arith.constant 0 : index
    %1 = vector.load %arg2[%c0_1, %c0_2] : memref<768x768xbf16, #tpu.memory_space<vmem>>, vector<768x768xbf16>
    %cst = arith.constant dense<0.000000e+00> : vector<16x768xf32>
    %2 = tpu.matmul %0, %1, %cst {dimension_numbers = #tpu.dot_dimension_numbers<[1], [0], [0], [1], [0, 0, 1, 1], [], []>} : vector<16x768xbf16>, vector<768x768xbf16>, vector<16x768xf32> -> vector<16x768xf32>
    %c0_3 = arith.constant 0 : index
    %c0_4 = arith.constant 0 : index
    %3 = vector.load %arg3[%c0_3, %c0_4] : memref<1x768xf32, #tpu.memory_space<vmem>>, vector<1x768xf32>
    %4 = vector.broadcast %3 : vector<1x768xf32> to vector<16x768xf32>
    %5 = arith.addf %2, %4 : vector<16x768xf32>
    %6 = math.tanh %5 : vector<16x768xf32>
    %7 = arith.truncf %6 : vector<16x768xf32> to vector<16x768xbf16>
    %c0_5 = arith.constant 0 : index
    %c0_6 = arith.constant 0 : index
    %8 = vector.load %arg4[%c0_5, %c0_6] : memref<768x128xbf16, #tpu.memory_space<vmem>>, vector<768x128xbf16>
    %cst_7 = arith.constant dense<0.000000e+00> : vector<16x128xf32>
    %9 = tpu.matmul %7, %8, %cst_7 {dimension_numbers = #tpu.dot_dimension_numbers<[1], [0], [0], [1], [0, 0, 1, 1], [], []>} : vector<16x768xbf16>, vector<768x128xbf16>, vector<16x128xf32> -> vector<16x128xf32>
    %c0_8 = arith.constant 0 : index
    %c0_9 = arith.constant 0 : index
    %10 = vector.load %arg5[%c0_8, %c0_9] : memref<1x128xf32, #tpu.memory_space<vmem>>, vector<1x128xf32>
    %11 = vector.broadcast %10 : vector<1x128xf32> to vector<16x128xf32>
    %12 = arith.addf %9, %11 : vector<16x128xf32>
    %cst_10 = arith.constant 0.000000e+00 : f32
    %13 = vector.broadcast %cst_10 : f32 to vector<16x128xf32>
    %14 = arith.maximumf %12, %13 : vector<16x128xf32>
    %15 = arith.truncf %14 : vector<16x128xf32> to vector<16x128xbf16>
    %c0_11 = arith.constant 0 : index
    %c0_12 = arith.constant 0 : index
    %16 = vector.load %arg6[%c0_11, %c0_12] : memref<128x128xbf16, #tpu.memory_space<vmem>>, vector<128x128xbf16>
    %cst_13 = arith.constant dense<0.000000e+00> : vector<16x128xf32>
    %17 = tpu.matmul %15, %16, %cst_13 {dimension_numbers = #tpu.dot_dimension_numbers<[1], [0], [0], [1], [0, 0, 1, 1], [], []>} : vector<16x128xbf16>, vector<128x128xbf16>, vector<16x128xf32> -> vector<16x128xf32>
    %c0_14 = arith.constant 0 : index
    %c0_15 = arith.constant 0 : index
    %18 = vector.load %arg7[%c0_14, %c0_15] : memref<1x128xf32, #tpu.memory_space<vmem>>, vector<1x128xf32>
    %19 = vector.broadcast %18 : vector<1x128xf32> to vector<16x128xf32>
    %20 = arith.addf %17, %19 : vector<16x128xf32>
    %c0_16 = arith.constant 0 : index
    %c0_17 = arith.constant 0 : index
    %21 = vector.load %arg8[%c0_16, %c0_17] : memref<16x128xf32, #tpu.memory_space<vmem>>, vector<16x128xf32>
    tpu.vector_store %arg8[%c0_16, %c0_17], %20 {strides = array<i32>} : memref<16x128xf32, #tpu.memory_space<vmem>>, vector<16x128xf32>,
    return
  }
  func.func @transform_0(%arg0: i32) -> (i32, i32) {
    %c0_i32 = arith.constant 0 : i32
    %c0_i32_0 = arith.constant 0 : i32
    return %arg0, %c0_i32 : i32, i32
  }
  func.func @transform_1(%arg0: i32) -> (i32, i32) {
    %c0_i32 = arith.constant 0 : i32
    %c0_i32_0 = arith.constant 0 : i32
    %c0_i32_1 = arith.constant 0 : i32
    return %c0_i32, %c0_i32_0 : i32, i32
  }
  func.func @transform_2(%arg0: i32) -> (i32, i32) {
    %c0_i32 = arith.constant 0 : i32
    %c0_i32_0 = arith.constant 0 : i32
    %c0_i32_1 = arith.constant 0 : i32
    return %c0_i32, %c0_i32_0 : i32, i32
  }
  func.func @transform_3(%arg0: i32) -> (i32, i32) {
    %c0_i32 = arith.constant 0 : i32
    %c0_i32_0 = arith.constant 0 : i32
    %c0_i32_1 = arith.constant 0 : i32
    return %c0_i32, %c0_i32_0 : i32, i32
  }
  func.func @transform_4(%arg0: i32) -> (i32, i32) {
    %c0_i32 = arith.constant 0 : i32
    %c0_i32_0 = arith.constant 0 : i32
    %c0_i32_1 = arith.constant 0 : i32
    return %c0_i32, %c0_i32_0 : i32, i32
  }
  func.func @transform_5(%arg0: i32) -> (i32, i32) {
    %c0_i32 = arith.constant 0 : i32
    %c0_i32_0 = arith.constant 0 : i32
    %c0_i32_1 = arith.constant 0 : i32
    return %c0_i32, %c0_i32_0 : i32, i32
  }
  func.func @transform_6(%arg0: i32) -> (i32, i32) {
    %c0_i32 = arith.constant 0 : i32
    %c0_i32_0 = arith.constant 0 : i32
    %c0_i32_1 = arith.constant 0 : i32
    return %c0_i32, %c0_i32_0 : i32, i32
  }
  func.func @transform_7(%arg0: i32) -> (i32, i32) {
    %c0_i32 = arith.constant 0 : i32
    %c0_i32_0 = arith.constant 0 : i32
    return %arg0, %c0_i32 : i32, i32
  }
}

</mosaic_0001>

<bundles_post_ra>
// kernel: tpu_custom_call.1
= control target key start
LH: loop header
LB: loop body
LE: loop exit
PB: predicated region body
PF: predicated region fallthrough
CT: control target
= control target key end

     0   :  { %12 = vsyncpa [#allocation3], 0  ;;  %s5209_s0 = inlined_call_operand.hbm [shape: bf16[16,768], index: 0, kind: input, shape index: {}]   ;;  %s5210_s1 = inlined_call_operand.hbm [shape: bf16[768,768], index: 1, kind: input, shape index: {}]   ;;  %s5211_s2 = inlined_call_operand.hbm [shape: f32[1,768], index: 2, kind: input, shape index: {}]   ;;  %s5212_s3 = inlined_call_operand.hbm [shape: bf16[768,128], index: 3, kind: input, shape index: {}]   ;;  %s5213_s4 = inlined_call_operand.hbm [shape: f32[1,128], index: 4, kind: input, shape index: {}]   ;;  %s5214_s5 = inlined_call_operand.hbm [shape: bf16[128,128], index: 5, kind: input, shape index: {}]   ;;  %s5215_s6 = inlined_call_operand.hbm [shape: f32[1,128], index: 6, kind: input, shape index: {}]   ;;  %s5216_s7 = inlined_call_operand.hbm [shape: f32[16,128], index: 7, kind: output, shape index: {}]  }
   0x1   :  { %13 = vsyncpa [#allocation6], 0 }
   0x2   :  { %14 = vsyncpa [#allocation9], 0 }
   0x3   :  { %15 = vsyncpa [#allocation12], 0 }
   0x4   :  { %16 = vsyncpa [#allocation4], 0  ;;  %s34_s26 = sshll.u32 %s5210_s1, 4  ;;  %s5003_s27 = smov [#allocation5]   ;;  %s35_s26 = int_to_ptr.hbm [resolvable:$true] %s34_s26 }
   0x5   :  { %s36_s28 = sshll.u32 %s5003_s27, 4  ;;  %s58_s8 = sshll.u32 %s5212_s3, 4  ;;  %s37_s28 = int_to_ptr.vmem [resolvable:$true] %s36_s28  ;;  %s59_s8 = int_to_ptr.hbm [resolvable:$true] %s58_s8 }
   0x6   :  { %s5004_s9 = smov 384   ;;  %s5005_s10 = smov 24  }
   0x7   :  { %42 = dma.hbm_to_vmem [thread:$0]  %s35_s26, 36864, %s37_s28, [#allocation6], %s5004_s9, %s5004_s9, %s5005_s10  }
   0x8   :  { %s5006_s11 = smov [#allocation8]   ;;  %s5007_s13 = smov 64  }
   0x9   :  { %s60_s12 = sshll.u32 %s5006_s11, 4  ;;  %s5008_s14 = smov 4   ;;  %s61_s12 = int_to_ptr.vmem [resolvable:$true] %s60_s12 }
   0xa   :  { %66 = dma.hbm_to_vmem [thread:$0]  %s59_s8, 6144, %s61_s12, [#allocation9], %s5007_s13, %s5007_s13, %s5008_s14  }
   0xb   :  { %s82_s16 = sshll.u32 %s5214_s5, 4  ;;  %s5009_s17 = smov [#allocation11]   ;;  %s83_s16 = int_to_ptr.hbm [resolvable:$true] %s82_s16 }
   0xc   :  { %s84_s18 = sshll.u32 %s5009_s17, 4  ;;  %s21_s20 = sshll.u32 %s5209_s0, 4  ;;  %s85_s18 = int_to_ptr.vmem [resolvable:$true] %s84_s18  ;;  %s22_s20 = int_to_ptr.hbm [resolvable:$true] %s21_s20 }
   0xd   :  { %90 = dma.hbm_to_vmem [thread:$0]  %s83_s16, 1024, %s85_s18, [#allocation12], %s5007_s13, %s5007_s13, %s5008_s14  }
   0xe   :  { %s5010_s21 = smov [#allocation2]   ;;  %s48_s25 = sshll.u32 %s5211_s2, 4  ;;  %s49_s25 = int_to_ptr.hbm [resolvable:$true] %s48_s25 }
   0xf   :  { %s23_s22 = sshll.u32 %s5010_s21, 4  ;;  %s72_s27 = sshll.u32 %s5213_s4, 4  ;;  %s24_s22 = int_to_ptr.vmem [resolvable:$true] %s23_s22  ;;  %s73_s27 = int_to_ptr.hbm [resolvable:$true] %s72_s27 }
  0x10   :  { %29 = dma.hbm_to_vmem [thread:$0]  %s22_s20, 768, %s24_s22, [#allocation3], %s5004_s9, %s5004_s9, %s5005_s10  }
  0x11   :  { %s5011_s28 = smov [#allocation7]   ;;  %s5012_s0 = smov [#allocation10]  }
  0x12   :  { %s50_s29 = sshll.u32 %s5011_s28, 4  ;;  %s74_s30 = sshll.u32 %s5012_s0, 4  ;;  %s51_s29 = int_to_ptr.vmem [resolvable:$true] %s50_s29  ;;  %s75_s30 = int_to_ptr.vmem [resolvable:$true] %s74_s30 }
  0x13   :  { %53 = dma.hbm_to_vmem [thread:$0]  %s49_s25, 96, %s51_s29, [#allocation6]  }
  0x14   :  { %s96_s12 = sshll.u32 %s5215_s6, 4  ;;  %s5013_s2 = smov [#allocation13]   ;;  %s97_s12 = int_to_ptr.hbm [resolvable:$true] %s96_s12 }
  0x15   :  { %77 = dma.hbm_to_vmem [thread:$0]  %s73_s27, 16, %s75_s30, [#allocation9]  }
  0x16   :  { %s98_s9 = sshll.u32 %s5013_s2, 4  ;;  %s99_s9 = int_to_ptr.vmem [resolvable:$true] %s98_s9 }
  0x17   :  { %101 = dma.hbm_to_vmem [thread:$0]  %s97_s12, 16, %s99_s9, [#allocation12]  }
  0x18   :  { %4993 = dma.done.wait [#allocation3], 768  }
  0x19   :  { %4994 = vsyncadd [#allocation3], 4294966528 }
  0x1a   :  { %4995 = dma.done.wait [#allocation6], 36960  }
  0x1b   :  { %4996 = vsyncadd [#allocation6], 4294930336 }
  0x1c   :  { %4997 = dma.done.wait [#allocation9], 6160  }
  0x1d   :  { %4998 = vsyncadd [#allocation9], 4294961136 }
  0x1e   :  { %4999 = dma.done.wait [#allocation12], 1040  }
  0x1f   :  { %5000 = vsyncadd [#allocation12], 4294966256  ;;  %v3205_v0 = vld [vmem:[#allocation5 + $0x150] sm:$0xf]  ;;  %v4462_v1 = vld [vmem:[#allocation5 + $0x164] sm:$0xf0] }
  0x20   :  { %v3397_v2 = vld [vmem:[#allocation5 + $0x2d0] sm:$0xf]  ;;  %v3206_v3 = vor.u32 %v4462_v1, %v3205_v0  ;;  %v4510_v4 = vld [vmem:[#allocation5 + $0x2e4] sm:$0xf0]  ;;  %v3181_v11 = vld [vmem:[#allocation5 + $0x120] sm:$0xf] }
  0x21   :  { %v3589_v5 = vld [vmem:[#allocation5 + $0x450] sm:$0xf]  ;;  %v4558_v6 = vld [vmem:[#allocation5 + $0x464] sm:$0xf0]  ;;  %v3398_v7 = vor.u32 %v4510_v4, %v3397_v2  ;;  %v4456_v13 = vld [vmem:[#allocation5 + $0x134] sm:$0xf0] }
  0x22   :  { %v3590_v8 = vor.u32 %v4558_v6, %v3589_v5  ;;  %v3781_v9 = vld [vmem:[#allocation5 + $0x5d0] sm:$0xf]  ;;  %v4606_v10 = vld [vmem:[#allocation5 + $0x5e4] sm:$0xf0]  ;;  %1908 = vmatpush.bf16.msra.mxu0 %v3206_v3  ;;  %v3373_v14 = vld [vmem:[#allocation5 + $0x2a0] sm:$0xf]  ;;  %v3182_v16 = vor.u32 %v4456_v13, %v3181_v11 }
  0x23   :  { %v3782_v12 = vor.u32 %v4606_v10, %v3781_v9  ;;  %v4504_v15 = vld [vmem:[#allocation5 + $0x2b4] sm:$0xf0]  ;;  %1922 = vmatpush.bf16.msra.mxu1 %v3398_v7  ;;  %v3565_v18 = vld [vmem:[#allocation5 + $0x420] sm:$0xf]  ;;  %v3157_v23 = vld [vmem:[#allocation5 + $0xf0] sm:$0xf] }
  0x24   :  { %1936 = vmatpush.bf16.msra.mxu2 %v3590_v8  ;;  %v3374_v17 = vor.u32 %v4504_v15, %v3373_v14  ;;  %v4552_v19 = vld [vmem:[#allocation5 + $0x434] sm:$0xf0]  ;;  %v3757_v20 = vld [vmem:[#allocation5 + $0x5a0] sm:$0xf]  ;;  %v4450_v24 = vld [vmem:[#allocation5 + $0x104] sm:$0xf0] }
  0x25   :  { %1950 = vmatpush.bf16.msra.mxu3 %v3782_v12  ;;  %v3566_v21 = vor.u32 %v4552_v19, %v3565_v18  ;;  %v4600_v22 = vld [vmem:[#allocation5 + $0x5b4] sm:$0xf0]  ;;  %v3349_v26 = vld [vmem:[#allocation5 + $0x270] sm:$0xf]  ;;  %v4498_v27 = vld [vmem:[#allocation5 + $0x284] sm:$0xf0]  ;;  %v3158_v29 = vor.u32 %v4450_v24, %v3157_v23 }
  0x26   :  { %v3758_v25 = vor.u32 %v4600_v22, %v3757_v20  ;;  %v3541_v28 = vld [vmem:[#allocation5 + $0x3f0] sm:$0xf]  ;;  %1909 = vmatpush.bf16.msra.mxu0 %v3182_v16  ;;  %v4546_v30 = vld [vmem:[#allocation5 + $0x404] sm:$0xf0]  ;;  %v3350_v33 = vor.u32 %v4498_v27, %v3349_v26  ;;  %v3133_v35 = vld [vmem:[#allocation5 + $0xc0] sm:$0xf] }
  0x27   :  { %v3733_v31 = vld [vmem:[#allocation5 + $0x570] sm:$0xf]  ;;  %v4594_v32 = vld [vmem:[#allocation5 + $0x584] sm:$0xf0]  ;;  %1923 = vmatpush.bf16.msra.mxu1 %v3374_v17  ;;  %v3542_v34 = vor.u32 %v4546_v30, %v3541_v28  ;;  %v4444_v36 = vld [vmem:[#allocation5 + $0xd4] sm:$0xf0] }
  0x28   :  { %1937 = vmatpush.bf16.msra.mxu2 %v3566_v21  ;;  %v3325_v37 = vld [vmem:[#allocation5 + $0x240] sm:$0xf]  ;;  %v3734_v38 = vor.u32 %v4594_v32, %v3733_v31  ;;  %v4492_v39 = vld [vmem:[#allocation5 + $0x254] sm:$0xf0]  ;;  %v3134_v44 = vor.u32 %v4444_v36, %v3133_v35  ;;  %v3109_v47 = vld [vmem:[#allocation5 + $0x90] sm:$0xf] }
  0x29   :  { %1951 = vmatpush.bf16.msra.mxu3 %v3758_v25  ;;  %v3517_v40 = vld [vmem:[#allocation5 + $0x3c0] sm:$0xf]  ;;  %v4540_v41 = vld [vmem:[#allocation5 + $0x3d4] sm:$0xf0]  ;;  %v3326_v45 = vor.u32 %v4492_v39, %v3325_v37  ;;  %v4438_v48 = vld [vmem:[#allocation5 + $0xa4] sm:$0xf0] }
  0x2a   :  { %v3709_v42 = vld [vmem:[#allocation5 + $0x540] sm:$0xf]  ;;  %v4588_v43 = vld [vmem:[#allocation5 + $0x554] sm:$0xf0]  ;;  %1910 = vmatpush.bf16.msra.mxu0 %v3158_v29  ;;  %v3518_v46 = vor.u32 %v4540_v41, %v3517_v40  ;;  %v3301_v49 = vld [vmem:[#allocation5 + $0x210] sm:$0xf]  ;;  %v3110_v56 = vor.u32 %v4438_v48, %v3109_v47 }
  0x2b   :  { %1924 = vmatpush.bf16.msra.mxu1 %v3350_v33  ;;  %v3710_v50 = vor.u32 %v4588_v43, %v3709_v42  ;;  %v4486_v51 = vld [vmem:[#allocation5 + $0x224] sm:$0xf0]  ;;  %v3493_v52 = vld [vmem:[#allocation5 + $0x390] sm:$0xf]  ;;  %v3085_v59 = vld [vmem:[#allocation5 + $0x60] sm:$0xf] }
  0x2c   :  { %1938 = vmatpush.bf16.msra.mxu2 %v3542_v34  ;;  %v4534_v53 = vld [vmem:[#allocation5 + $0x3a4] sm:$0xf0]  ;;  %v3685_v54 = vld [vmem:[#allocation5 + $0x510] sm:$0xf]  ;;  %v3302_v57 = vor.u32 %v4486_v51, %v3301_v49  ;;  %v4432_v60 = vld [vmem:[#allocation5 + $0x74] sm:$0xf0] }
  0x2d   :  { %1952 = vmatpush.bf16.msra.mxu3 %v3734_v38  ;;  %v4582_v55 = vld [vmem:[#allocation5 + $0x524] sm:$0xf0]  ;;  %v3494_v58 = vor.u32 %v4534_v53, %v3493_v52  ;;  %v3277_v61 = vld [vmem:[#allocation5 + $0x1e0] sm:$0xf]  ;;  %v4480_v63 = vld [vmem:[#allocation5 + $0x1f4] sm:$0xf0]  ;;  %v3086_v4 = vor.u32 %v4432_v60, %v3085_v59 }
  0x2e   :  { %1911 = vmatpush.bf16.msra.mxu0 %v3134_v44  ;;  %v3686_v62 = vor.u32 %v4582_v55, %v3685_v54  ;;  %v3469_v0 = vld [vmem:[#allocation5 + $0x360] sm:$0xf]  ;;  %v4528_v1 = vld [vmem:[#allocation5 + $0x374] sm:$0xf0]  ;;  %v3278_v5 = vor.u32 %v4480_v63, %v3277_v61  ;;  %v3061_v7 = vld [vmem:[#allocation5 + $0x30] sm:$0xf] }
  0x2f   :  { %1925 = vmatpush.bf16.msra.mxu1 %v3326_v45  ;;  %v3661_v2 = vld [vmem:[#allocation5 + $0x4e0] sm:$0xf]  ;;  %v4576_v3 = vld [vmem:[#allocation5 + $0x4f4] sm:$0xf0]  ;;  %v3470_v6 = vor.u32 %v4528_v1, %v3469_v0  ;;  %v4426_v8 = vld [vmem:[#allocation5 + $0x44] sm:$0xf0] }
  0x30   :  { %1939 = vmatpush.bf16.msra.mxu2 %v3518_v46  ;;  %v3253_v9 = vld [vmem:[#allocation5 + $0x1b0] sm:$0xf]  ;;  %v3662_v10 = vor.u32 %v4576_v3, %v3661_v2  ;;  %v4474_v11 = vld [vmem:[#allocation5 + $0x1c4] sm:$0xf0]  ;;  %v3062_v16 = vor.u32 %v4426_v8, %v3061_v7  ;;  %v3037_v17 = vld [vmem:[#allocation5] sm:$0xf] }
  0x31   :  { %1953 = vmatpush.bf16.msra.mxu3 %v3710_v50  ;;  %v3445_v12 = vld [vmem:[#allocation5 + $0x330] sm:$0xf]  ;;  %v4522_v13 = vld [vmem:[#allocation5 + $0x344] sm:$0xf0]  ;;  %v4420_v18 = vld [vmem:[#allocation5 + $0x14] sm:$0xf0]  ;;  %v3254_v19 = vor.u32 %v4474_v11, %v3253_v9 }
  0x32   :  { %1912 = vmatpush.bf16.msra.mxu0 %v3110_v56  ;;  %v3637_v14 = vld [vmem:[#allocation5 + $0x4b0] sm:$0xf]  ;;  %v4570_v15 = vld [vmem:[#allocation5 + $0x4c4] sm:$0xf0]  ;;  %v3446_v20 = vor.u32 %v4522_v13, %v3445_v12  ;;  %v3229_v21 = vld [vmem:[#allocation5 + $0x180] sm:$0xf]  ;;  %v3038_v31 = vor.u32 %v4420_v18, %v3037_v17 }
  0x33   :  { %1926 = vmatpush.bf16.msra.mxu1 %v3302_v57  ;;  %v4468_v22 = vld [vmem:[#allocation5 + $0x194] sm:$0xf0]  ;;  %v3421_v23 = vld [vmem:[#allocation5 + $0x300] sm:$0xf]  ;;  %v3638_v24 = vor.u32 %v4570_v15, %v3637_v14  ;;  %v3973_v28 = vld [vmem:[#allocation5 + $0x750] sm:$0xf] }
  0x34   :  { %1940 = vmatpush.bf16.msra.mxu2 %v3494_v58  ;;  %v4516_v25 = vld [vmem:[#allocation5 + $0x314] sm:$0xf0]  ;;  %v3613_v26 = vld [vmem:[#allocation5 + $0x480] sm:$0xf]  ;;  %v4654_v29 = vld [vmem:[#allocation5 + $0x764] sm:$0xf0]  ;;  %v3230_v35 = vor.u32 %v4468_v22, %v3229_v21 }
  0x35   :  { %1954 = vmatpush.bf16.msra.mxu3 %v3686_v62  ;;  %v4564_v27 = vld [vmem:[#allocation5 + $0x494] sm:$0xf0]  ;;  %v4165_v30 = vld [vmem:[#allocation5 + $0x8d0] sm:$0xf]  ;;  %v4702_v32 = vld [vmem:[#allocation5 + $0x8e4] sm:$0xf0]  ;;  %v3422_v36 = vor.u32 %v4516_v25, %v3421_v23  ;;  %v3974_v40 = vor.u32 %v4654_v29, %v3973_v28 }
  0x36   :  { %1913 = vmatpush.bf16.msra.mxu0 %v3086_v4  ;;  %v4459_v33 = vld [vmem:[#allocation5 + $0x154] sm:$0xf]  ;;  %v3207_v34 = vld [vmem:[#allocation5 + $0x168] sm:$0xf0]  ;;  %v3614_v39 = vor.u32 %v4564_v27, %v3613_v26  ;;  %v3949_v41 = vld [vmem:[#allocation5 + $0x720] sm:$0xf]  ;;  %v4166_v42 = vor.u32 %v4702_v32, %v4165_v30 }
  0x37   :  { %1927 = vmatpush.bf16.msra.mxu1 %v3278_v5  ;;  %v4507_v37 = vld [vmem:[#allocation5 + $0x2d4] sm:$0xf]  ;;  %v3399_v38 = vld [vmem:[#allocation5 + $0x2e8] sm:$0xf0]  ;;  %v3210_v43 = vor.u32 %v4459_v33, %v3207_v34  ;;  %v4648_v44 = vld [vmem:[#allocation5 + $0x734] sm:$0xf0] }
  0x38   :  { %1941 = vmatpush.bf16.msra.mxu2 %v3470_v6  ;;  %v4141_v45 = vld [vmem:[#allocation5 + $0x8a0] sm:$0xf]  ;;  %v4696_v46 = vld [vmem:[#allocation5 + $0x8b4] sm:$0xf0]  ;;  %v3402_v47 = vor.u32 %v4507_v37, %v3399_v38  ;;  %v4453_v48 = vld [vmem:[#allocation5 + $0x124] sm:$0xf]  ;;  %v3950_v54 = vor.u32 %v4648_v44, %v3949_v41 }
  0x39   :  { %1955 = vmatpush.bf16.msra.mxu3 %v3662_v10  ;;  %v3183_v49 = vld [vmem:[#allocation5 + $0x138] sm:$0xf0]  ;;  %v4501_v50 = vld [vmem:[#allocation5 + $0x2a4] sm:$0xf]  ;;  %v3013_v52 = vld [vmem:[#allocation2] sm:$0xf]  ;;  %v4142_v58 = vor.u32 %v4696_v46, %v4141_v45 }
  0x3a   :  { %1914 = vmatpush.bf16.msra.mxu0 %v3062_v16  ;;  %v3375_v51 = vld [vmem:[#allocation5 + $0x2b8] sm:$0xf0]  ;;  %v4414_v53 = vld [vmem:[#allocation2 + $0x14] sm:$0xf0]  ;;  %v3925_v55 = vld [vmem:[#allocation5 + $0x6f0] sm:$0xf]  ;;  %v3186_v59 = vor.u32 %v4453_v48, %v3183_v49 }
  0x3b   :  { %1928 = vmatpush.bf16.msra.mxu1 %v3254_v19  ;;  %v4642_v56 = vld [vmem:[#allocation5 + $0x704] sm:$0xf0]  ;;  %v5078_v57 = vor.u32 %v4414_v53, %v3013_v52  ;;  %v4117_v60 = vld [vmem:[#allocation5 + $0x870] sm:$0xf]  ;;  %v4447_v62 = vld [vmem:[#allocation5 + $0xf4] sm:$0xf]  ;;  %v3378_v63 = vor.u32 %v4501_v50, %v3375_v51 }
  0x3c   :  { %1942 = vmatpush.bf16.msra.mxu2 %v3446_v20  ;;  %v4690_v61 = vld [vmem:[#allocation5 + $0x884] sm:$0xf0]  ;;  %v3159_v0 = vld [vmem:[#allocation5 + $0x108] sm:$0xf0]  ;;  %v4411_v1 = vld [vmem:[#allocation2 + $0x4] sm:$0xf]  ;;  %v3926_v7 = vor.u32 %v4642_v56, %v3925_v55 }
  0x3d   :  { %1956 = vmatpush.bf16.msra.mxu3 %v3638_v24  ;;  %v3015_v2 = vld [vmem:[#allocation2 + $0x18] sm:$0xf0]  ;;  %v4495_v3 = vld [vmem:[#allocation5 + $0x274] sm:$0xf]  ;;  %v3901_v5 = vld [vmem:[#allocation5 + $0x6c0] sm:$0xf]  ;;  %v4118_v11 = vor.u32 %v4690_v61, %v4117_v60  ;;  %v3162_v12 = vor.u32 %v4447_v62, %v3159_v0 }
  0x3e   :  { %1915 = vmatpush.bf16.msra.mxu0 %v3038_v31  ;;  %v3351_v4 = vld [vmem:[#allocation5 + $0x288] sm:$0xf0]  ;;  %v5081_v6 = vor.u32 %v4411_v1, %v3015_v2  ;;  %v4636_v8 = vld [vmem:[#allocation5 + $0x6d4] sm:$0xf0]  ;;  %v4093_v9 = vld [vmem:[#allocation5 + $0x840] sm:$0xf] }
  0x3f   :  { %1929 = vmatpush.bf16.msra.mxu1 %v3230_v35  ;;  %v4684_v10 = vld [vmem:[#allocation5 + $0x854] sm:$0xf0]  ;;  %v4441_v13 = vld [vmem:[#allocation5 + $0xc4] sm:$0xf]  ;;  %v3135_v14 = vld [vmem:[#allocation5 + $0xd8] sm:$0xf0]  ;;  %v3354_v16 = vor.u32 %v4495_v3, %v3351_v4  ;;  %v3902_v24 = vor.u32 %v4636_v8, %v3901_v5 }
  0x40   :  { %1943 = vmatpush.bf16.msra.mxu2 %v3422_v36  ;;  %v3021_v15 = vld [vmem:[#allocation2 + $0x8] sm:$0xf]  ;;  %v4415_v17 = vld [vmem:[#allocation2 + $0x1c] sm:$0xf0]  ;;  %v4412_v18 = vld [vmem:[#allocation2 + $0xc] sm:$0xf]  ;;  %v4094_v25 = vor.u32 %v4684_v10, %v4093_v9  ;;  %v3138_v26 = vor.u32 %v4441_v13, %v3135_v14 }
  0x41   :  { %1957 = vmatpush.bf16.msra.mxu3 %v3614_v39  ;;  %1916 = vmatmul.bf16.vlgmr.msra.gmra.mxu0 %v5078_v57  ;;  %v3023_v19 = vld [vmem:[#allocation2 + $0x20] sm:$0xf0]  ;;  %v4489_v20 = vld [vmem:[#allocation5 + $0x244] sm:$0xf]  ;;  %v3327_v21 = vld [vmem:[#allocation5 + $0x258] sm:$0xf0]  ;;  %v5084_v22 = vor.u32 %v4415_v17, %v3021_v15 }
  0x42   :  { %1964 = vmatpush.bf16.msrb.mxu0 %v3974_v40  ;;  %1930 = vmatmul.bf16.vlgmr.msra.gmra.mxu1 %v5081_v6  ;;  %v5086_v23 = vor.u32 %v4412_v18, %v3023_v19  ;;  %v3877_v27 = vld [vmem:[#allocation5 + $0x690] sm:$0xf]  ;;  %v4630_v28 = vld [vmem:[#allocation5 + $0x6a4] sm:$0xf0]  ;;  %v3330_v30 = vor.u32 %v4489_v20, %v3327_v21  ;;  %v4435_v32 = vld [vmem:[#allocation5 + $0x94] sm:$0xf] }
  0x43   :  { %1978 = vmatpush.bf16.msrb.mxu1 %v4166_v42  ;;  %v4069_v29 = vld [vmem:[#allocation5 + $0x810] sm:$0xf]  ;;  %v4678_v31 = vld [vmem:[#allocation5 + $0x824] sm:$0xf0]  ;;  %v3111_v33 = vld [vmem:[#allocation5 + $0xa8] sm:$0xf0]  ;;  %1944 = vmatmul.bf16.vlgmr.msra.gmra.mxu2 %v5084_v22  ;;  %v3878_v36 = vor.u32 %v4630_v28, %v3877_v27 }
  0x44   :  { %1992 = vmatpush.bf16.msrb.mxu2 %v3210_v43  ;;  %v4483_v34 = vld [vmem:[#allocation5 + $0x214] sm:$0xf]  ;;  %v3303_v35 = vld [vmem:[#allocation5 + $0x228] sm:$0xf0]  ;;  %1958 = vmatmul.bf16.vlgmr.msra.gmra.mxu3 %v5086_v23  ;;  %v4070_v37 = vor.u32 %v4678_v31, %v4069_v29  ;;  %v3114_v38 = vor.u32 %v4435_v32, %v3111_v33  ;;  %v3853_v39 = vld [vmem:[#allocation5 + $0x660] sm:$0xf] }
  0x45   :  { %2006 = vmatpush.bf16.msrb.mxu3 %v3402_v47  ;;  %v4624_v40 = vld [vmem:[#allocation5 + $0x674] sm:$0xf0]  ;;  %v4045_v41 = vld [vmem:[#allocation5 + $0x7e0] sm:$0xf]  ;;  %v3306_v42 = vor.u32 %v4483_v34, %v3303_v35  ;;  %v4429_v44 = vld [vmem:[#allocation5 + $0x64] sm:$0xf] }
  0x46   :  { %1965 = vmatpush.bf16.msrb.mxu0 %v3950_v54  ;;  %v4672_v43 = vld [vmem:[#allocation5 + $0x7f4] sm:$0xf0]  ;;  %v3087_v45 = vld [vmem:[#allocation5 + $0x78] sm:$0xf0]  ;;  %v4477_v46 = vld [vmem:[#allocation5 + $0x1e4] sm:$0xf]  ;;  %v3854_v48 = vor.u32 %v4624_v40, %v3853_v39 }
  0x47   :  { %1979 = vmatpush.bf16.msrb.mxu1 %v4142_v58  ;;  %v3279_v47 = vld [vmem:[#allocation5 + $0x1f8] sm:$0xf0]  ;;  %v4046_v49 = vor.u32 %v4672_v43, %v4045_v41  ;;  %v3090_v50 = vor.u32 %v4429_v44, %v3087_v45  ;;  %v3829_v51 = vld [vmem:[#allocation5 + $0x630] sm:$0xf]  ;;  %v4618_v52 = vld [vmem:[#allocation5 + $0x644] sm:$0xf0] }
  0x48   :  { %1993 = vmatpush.bf16.msrb.mxu2 %v3186_v59  ;;  %v4021_v53 = vld [vmem:[#allocation5 + $0x7b0] sm:$0xf]  ;;  %v3282_v54 = vor.u32 %v4477_v46, %v3279_v47  ;;  %v4666_v55 = vld [vmem:[#allocation5 + $0x7c4] sm:$0xf0]  ;;  %v4423_v56 = vld [vmem:[#allocation5 + $0x34] sm:$0xf]  ;;  %v3830_v61 = vor.u32 %v4618_v52, %v3829_v51 }
  0x49   :  { %2007 = vmatpush.bf16.msrb.mxu3 %v3378_v63  ;;  %v3063_v58 = vld [vmem:[#allocation5 + $0x48] sm:$0xf0]  ;;  %v4471_v59 = vld [vmem:[#allocation5 + $0x1b4] sm:$0xf]  ;;  %v3805_v62 = vld [vmem:[#allocation5 + $0x600] sm:$0xf]  ;;  %v4022_v1 = vor.u32 %v4666_v55, %v4021_v53 }
  0x4a   :  { %1966 = vmatpush.bf16.msrb.mxu0 %v3926_v7  ;;  %v3255_v60 = vld [vmem:[#allocation5 + $0x1c8] sm:$0xf0]  ;;  %v4612_v63 = vld [vmem:[#allocation5 + $0x614] sm:$0xf0]  ;;  %v3997_v0 = vld [vmem:[#allocation5 + $0x780] sm:$0xf]  ;;  %v3066_v2 = vor.u32 %v4423_v56, %v3063_v58 }
  0x4b   :  { %1980 = vmatpush.bf16.msrb.mxu1 %v4118_v11  ;;  %v4660_v3 = vld [vmem:[#allocation5 + $0x794] sm:$0xf0]  ;;  %v4417_v4 = vld [vmem:[#allocation5 + $0x4] sm:$0xf]  ;;  %v3039_v5 = vld [vmem:[#allocation5 + $0x18] sm:$0xf0]  ;;  %v3258_v7 = vor.u32 %v4471_v59, %v3255_v60  ;;  %v3806_v14 = vor.u32 %v4612_v63, %v3805_v62 }
  0x4c   :  { %1994 = vmatpush.bf16.msrb.mxu2 %v3162_v12  ;;  %v4465_v8 = vld [vmem:[#allocation5 + $0x184] sm:$0xf]  ;;  %v3231_v9 = vld [vmem:[#allocation5 + $0x198] sm:$0xf0]  ;;  %v4555_v10 = vld [vmem:[#allocation5 + $0x454] sm:$0xf]  ;;  %v3998_v18 = vor.u32 %v4660_v3, %v3997_v0  ;;  %v3042_v19 = vor.u32 %v4417_v4, %v3039_v5 }
  0x4d   :  { %2008 = vmatpush.bf16.msrb.mxu3 %v3354_v16  ;;  %v3591_v11 = vld [vmem:[#allocation5 + $0x468] sm:$0xf0]  ;;  %v4603_v12 = vld [vmem:[#allocation5 + $0x5d4] sm:$0xf]  ;;  %v3029_v21 = vld [vmem:[#allocation2 + $0x10] sm:$0xf] }
  0x4e   :  { %1967 = vmatpush.bf16.msrb.mxu0 %v3902_v24  ;;  %v3783_v13 = vld [vmem:[#allocation5 + $0x5e8] sm:$0xf0]  ;;  %v4651_v15 = vld [vmem:[#allocation5 + $0x754] sm:$0xf]  ;;  %v4416_v24 = vld [vmem:[#allocation2 + $0x24] sm:$0xf0] }
  0x4f   :  { %1981 = vmatpush.bf16.msrb.mxu1 %v4094_v25  ;;  %v3975_v16 = vld [vmem:[#allocation5 + $0x768] sm:$0xf0]  ;;  %v4699_v17 = vld [vmem:[#allocation5 + $0x8d4] sm:$0xf]  ;;  %v3234_v25 = vor.u32 %v4465_v8, %v3231_v9  ;;  %v4413_v27 = vld [vmem:[#allocation2 + $0x14] sm:$0xf]  ;;  %v3786_v29 = vor.u32 %v4603_v12, %v3783_v13  ;;  %v5090_v35 = vor.u32 %v4416_v24, %v3029_v21 }
  0x50   :  { %1995 = vmatpush.bf16.msrb.mxu2 %v3138_v26  ;;  %v4167_v20 = vld [vmem:[#allocation5 + $0x8e8] sm:$0xf0]  ;;  %v3594_v26 = vor.u32 %v4555_v10, %v3591_v11  ;;  %v3031_v28 = vld [vmem:[#allocation2 + $0x28] sm:$0xf0]  ;;  %v4549_v31 = vld [vmem:[#allocation5 + $0x424] sm:$0xf] }
  0x51   :  { %2009 = vmatpush.bf16.msrb.mxu3 %v3330_v30  ;;  %v3978_v30 = vor.u32 %v4651_v15, %v3975_v16  ;;  %v3567_v32 = vld [vmem:[#allocation5 + $0x438] sm:$0xf0]  ;;  %v4597_v33 = vld [vmem:[#allocation5 + $0x5a4] sm:$0xf]  ;;  %v4170_v34 = vor.u32 %v4699_v17, %v4167_v20  ;;  %v5092_v39 = vor.u32 %v4413_v27, %v3031_v28  ;;  %v4543_v45 = vld [vmem:[#allocation5 + $0x3f4] sm:$0xf] }
  0x52   :  { %1968 = vmatpush.bf16.msrb.mxu0 %v3878_v36  ;;  %v3759_v36 = vld [vmem:[#allocation5 + $0x5b8] sm:$0xf0]  ;;  %v4693_v40 = vld [vmem:[#allocation5 + $0x8a4] sm:$0xf]  ;;  %v3543_v46 = vld [vmem:[#allocation5 + $0x408] sm:$0xf0] }
  0x53   :  { %1982 = vmatpush.bf16.msrb.mxu1 %v4070_v37  ;;  %v4645_v37 = vld [vmem:[#allocation5 + $0x724] sm:$0xf]  ;;  %v4143_v41 = vld [vmem:[#allocation5 + $0x8b8] sm:$0xf0]  ;;  %v3762_v43 = vor.u32 %v4597_v33, %v3759_v36  ;;  %v4591_v47 = vld [vmem:[#allocation5 + $0x574] sm:$0xf] }
  0x54   :  { %1996 = vmatpush.bf16.msrb.mxu2 %v3114_v38  ;;  %v3951_v38 = vld [vmem:[#allocation5 + $0x738] sm:$0xf0]  ;;  %v3927_v51 = vld [vmem:[#allocation5 + $0x708] sm:$0xf0]  ;;  %v4687_v52 = vld [vmem:[#allocation5 + $0x874] sm:$0xf] }
  0x55   :  { %2010 = vmatpush.bf16.msrb.mxu3 %v3306_v42  ;;  %v3570_v42 = vor.u32 %v4549_v31, %v3567_v32  ;;  %v3954_v44 = vor.u32 %v4645_v37, %v3951_v38  ;;  %v4119_v53 = vld [vmem:[#allocation5 + $0x888] sm:$0xf0]  ;;  %v4537_v58 = vld [vmem:[#allocation5 + $0x3c4] sm:$0xf]  ;;  %v3519_v59 = vld [vmem:[#allocation5 + $0x3d8] sm:$0xf0] }
  0x56   :  { %1969 = vmatpush.bf16.msrb.mxu0 %v3854_v48  ;;  %v4146_v48 = vor.u32 %v4693_v40, %v4143_v41  ;;  %v4585_v60 = vld [vmem:[#allocation5 + $0x544] sm:$0xf]  ;;  %v3711_v62 = vld [vmem:[#allocation5 + $0x558] sm:$0xf0]  ;;  %v3522_v3 = vor.u32 %v4537_v58, %v3519_v59  ;;  %v3495_v8 = vld [vmem:[#allocation5 + $0x3a8] sm:$0xf0] }
  0x57   :  { %1983 = vmatpush.bf16.msrb.mxu1 %v4046_v49  ;;  %v3735_v49 = vld [vmem:[#allocation5 + $0x588] sm:$0xf0]  ;;  %v4633_v63 = vld [vmem:[#allocation5 + $0x6c4] sm:$0xf]  ;;  %v3903_v0 = vld [vmem:[#allocation5 + $0x6d8] sm:$0xf0]  ;;  %v3714_v4 = vor.u32 %v4585_v60, %v3711_v62 }
  0x58   :  { %1997 = vmatpush.bf16.msrb.mxu2 %v3090_v50  ;;  %v4639_v50 = vld [vmem:[#allocation5 + $0x6f4] sm:$0xf]  ;;  %v3738_v55 = vor.u32 %v4591_v47, %v3735_v49  ;;  %v3906_v5 = vor.u32 %v4633_v63, %v3903_v0  ;;  %v3687_v11 = vld [vmem:[#allocation5 + $0x528] sm:$0xf0]  ;;  %v3471_v20 = vld [vmem:[#allocation5 + $0x378] sm:$0xf0] }
  0x59   :  { %2011 = vmatpush.bf16.msrb.mxu3 %v3282_v54  ;;  %v3546_v54 = vor.u32 %v4543_v45, %v3543_v46  ;;  %v3930_v56 = vor.u32 %v4639_v50, %v3927_v51  ;;  %v4579_v9 = vld [vmem:[#allocation5 + $0x514] sm:$0xf]  ;;  %v3879_v13 = vld [vmem:[#allocation5 + $0x6a8] sm:$0xf0]  ;;  %v4573_v21 = vld [vmem:[#allocation5 + $0x4e4] sm:$0xf] }
  0x5a   :  { %1970 = vmatpush.bf16.msrb.mxu0 %v3830_v61  ;;  %v4122_v61 = vor.u32 %v4687_v52, %v4119_v53  ;;  %v4627_v12 = vld [vmem:[#allocation5 + $0x694] sm:$0xf]  ;;  %v4071_v15 = vld [vmem:[#allocation5 + $0x828] sm:$0xf0]  ;;  %v3690_v17 = vor.u32 %v4579_v9, %v3687_v11  ;;  %v3855_v27 = vld [vmem:[#allocation5 + $0x678] sm:$0xf0] }
  0x5b   :  { %1984 = vmatpush.bf16.msrb.mxu1 %v4022_v1  ;;  %v4681_v1 = vld [vmem:[#allocation5 + $0x844] sm:$0xf]  ;;  %v4519_v33 = vld [vmem:[#allocation5 + $0x334] sm:$0xf]  ;;  %v3639_v38 = vld [vmem:[#allocation5 + $0x4c8] sm:$0xf0] }
  0x5c   :  { %1998 = vmatpush.bf16.msrb.mxu2 %v3066_v2  ;;  %v4095_v2 = vld [vmem:[#allocation5 + $0x858] sm:$0xf0]  ;;  %v4669_v28 = vld [vmem:[#allocation5 + $0x7e4] sm:$0xf]  ;;  %v4567_v36 = vld [vmem:[#allocation5 + $0x4b4] sm:$0xf] }
  0x5d   :  { %2012 = vmatpush.bf16.msrb.mxu3 %v3258_v7  ;;  %v4531_v7 = vld [vmem:[#allocation5 + $0x394] sm:$0xf]  ;;  %v4098_v10 = vor.u32 %v4681_v1, %v4095_v2  ;;  %v3831_v41 = vld [vmem:[#allocation5 + $0x648] sm:$0xf0]  ;;  %v3423_v46 = vld [vmem:[#allocation5 + $0x318] sm:$0xf0]  ;;  %v3642_v49 = vor.u32 %v4567_v36, %v3639_v38 }
  0x5e   :  { %1971 = vmatpush.bf16.msrb.mxu0 %v3806_v14  ;;  %v4675_v14 = vld [vmem:[#allocation5 + $0x814] sm:$0xf]  ;;  %v3498_v16 = vor.u32 %v4531_v7, %v3495_v8  ;;  %v4561_v47 = vld [vmem:[#allocation5 + $0x484] sm:$0xf]  ;;  %v3807_v52 = vld [vmem:[#allocation5 + $0x618] sm:$0xf0] }
  0x5f   :  { %1985 = vmatpush.bf16.msrb.mxu1 %v3998_v18  ;;  %v3882_v18 = vor.u32 %v4627_v12, %v3879_v13  ;;  %v4074_v24 = vor.u32 %v4675_v14, %v4071_v15  ;;  %v4615_v40 = vld [vmem:[#allocation5 + $0x634] sm:$0xf]  ;;  %v4609_v51 = vld [vmem:[#allocation5 + $0x604] sm:$0xf]  ;;  %v4463_v58 = vld [vmem:[#allocation5 + $0x16c] sm:$0xf0] }
  0x60   :  { %1999 = vmatpush.bf16.msrb.mxu2 %v3042_v19  ;;  %v4525_v19 = vld [vmem:[#allocation5 + $0x364] sm:$0xf]  ;;  %v3834_v50 = vor.u32 %v4615_v40, %v3831_v41  ;;  %v3405_v59 = vld [vmem:[#allocation5 + $0x2d8] sm:$0xf]  ;;  %v4511_v60 = vld [vmem:[#allocation5 + $0x2ec] sm:$0xf0]  ;;  %v3810_v1 = vor.u32 %v4609_v51, %v3807_v52 }
  0x61   :  { %2013 = vmatpush.bf16.msrb.mxu3 %v3234_v25  ;;  %1972 = vmatmul.bf16.vlgmr.msrb.gmra.mxu0 %v5090_v35  ;;  %v3663_v25 = vld [vmem:[#allocation5 + $0x4f8] sm:$0xf0]  ;;  %v4657_v53 = vld [vmem:[#allocation5 + $0x784] sm:$0xf]  ;;  %v3597_v62 = vld [vmem:[#allocation5 + $0x458] sm:$0xf]  ;;  %v3406_v7 = vor.u32 %v4511_v60, %v3405_v59 }
  0x62   :  { %2020 = vmatpush.bf16.msra.mxu0 %v3594_v26  ;;  %1986 = vmatmul.bf16.vlgmr.msrb.gmra.mxu1 %v5092_v39  ;;  %v4621_v26 = vld [vmem:[#allocation5 + $0x664] sm:$0xf]  ;;  %v3666_v31 = vor.u32 %v4573_v21, %v3663_v25  ;;  %v4559_v63 = vld [vmem:[#allocation5 + $0x46c] sm:$0xf0]  ;;  %v3789_v2 = vld [vmem:[#allocation5 + $0x5d8] sm:$0xf] }
  0x63   :  { %2034 = vmatpush.bf16.msra.mxu1 %v3786_v29  ;;  %2000 = vmatmul.bf16.vlgmr.msrb.gmra.mxu2 %v5078_v57  ;;  %v4047_v29 = vld [vmem:[#allocation5 + $0x7f8] sm:$0xf0]  ;;  %v3858_v32 = vor.u32 %v4621_v26, %v3855_v27  ;;  %v3598_v8 = vor.u32 %v4559_v63, %v3597_v62  ;;  %v3189_v9 = vld [vmem:[#allocation5 + $0x128] sm:$0xf]  ;;  %v4505_v13 = vld [vmem:[#allocation5 + $0x2bc] sm:$0xf0] }
  0x64   :  { %2048 = vmatpush.bf16.msra.mxu2 %v3978_v30  ;;  %2014 = vmatmul.bf16.vlgmr.msrb.gmra.mxu3 %v5081_v6  ;;  %v3474_v30 = vor.u32 %v4525_v19, %v3471_v20  ;;  %v4050_v37 = vor.u32 %v4669_v28, %v4047_v29  ;;  %v3381_v11 = vld [vmem:[#allocation5 + $0x2a8] sm:$0xf]  ;;  %v4553_v15 = vld [vmem:[#allocation5 + $0x43c] sm:$0xf0]  ;;  %v3165_v21 = vld [vmem:[#allocation5 + $0xf8] sm:$0xf] }
  0x65   :  { %2062 = vmatpush.bf16.msra.mxu3 %v4170_v34  ;;  %v3447_v34 = vld [vmem:[#allocation5 + $0x348] sm:$0xf0]  ;;  %v3573_v14 = vld [vmem:[#allocation5 + $0x428] sm:$0xf]  ;;  %v3382_v19 = vor.u32 %v4505_v13, %v3381_v11  ;;  %v3357_v25 = vld [vmem:[#allocation5 + $0x278] sm:$0xf] }
  0x66   :  { %2021 = vmatpush.bf16.msra.mxu0 %v3570_v42  ;;  %v4663_v42 = vld [vmem:[#allocation5 + $0x7b4] sm:$0xf]  ;;  %v3450_v45 = vor.u32 %v4519_v33, %v3447_v34  ;;  %v3574_v20 = vor.u32 %v4553_v15, %v3573_v14  ;;  %v4499_v27 = vld [vmem:[#allocation5 + $0x28c] sm:$0xf0]  ;;  %v3549_v28 = vld [vmem:[#allocation5 + $0x3f8] sm:$0xf] }
  0x67   :  { %2035 = vmatpush.bf16.msra.mxu1 %v3762_v43  ;;  %v4023_v43 = vld [vmem:[#allocation5 + $0x7c8] sm:$0xf0]  ;;  %v4547_v29 = vld [vmem:[#allocation5 + $0x40c] sm:$0xf0]  ;;  %v3358_v33 = vor.u32 %v4499_v27, %v3357_v25  ;;  %v3141_v36 = vld [vmem:[#allocation5 + $0xc8] sm:$0xf] }
  0x68   :  { %2049 = vmatpush.bf16.msra.mxu2 %v3954_v44  ;;  %v4513_v44 = vld [vmem:[#allocation5 + $0x304] sm:$0xf]  ;;  %v3550_v34 = vor.u32 %v4547_v29, %v3549_v28  ;;  %v3333_v38 = vld [vmem:[#allocation5 + $0x248] sm:$0xf]  ;;  %v4493_v41 = vld [vmem:[#allocation5 + $0x25c] sm:$0xf0] }
  0x69   :  { %2063 = vmatpush.bf16.msra.mxu3 %v4146_v48  ;;  %v3615_v48 = vld [vmem:[#allocation5 + $0x498] sm:$0xf0]  ;;  %v3309_v51 = vld [vmem:[#allocation5 + $0x218] sm:$0xf]  ;;  %v3093_v62 = vld [vmem:[#allocation5 + $0x68] sm:$0xf] }
  0x6a   :  { %2022 = vmatpush.bf16.msra.mxu0 %v3546_v54  ;;  %v4026_v54 = vor.u32 %v4663_v42, %v4023_v43  ;;  %v3618_v0 = vor.u32 %v4561_v47, %v3615_v48  ;;  %v3525_v42 = vld [vmem:[#allocation5 + $0x3c8] sm:$0xf]  ;;  %v4541_v43 = vld [vmem:[#allocation5 + $0x3dc] sm:$0xf0]  ;;  %v3334_v47 = vor.u32 %v4493_v41, %v3333_v38  ;;  %v3069_v11 = vld [vmem:[#allocation5 + $0x38] sm:$0xf] }
  0x6b   :  { %2036 = vmatpush.bf16.msra.mxu1 %v3738_v55  ;;  %v3999_v55 = vld [vmem:[#allocation5 + $0x798] sm:$0xf0]  ;;  %v3526_v48 = vor.u32 %v4541_v43, %v3525_v42  ;;  %v4433_v63 = vld [vmem:[#allocation5 + $0x7c] sm:$0xf0]  ;;  %v3261_v13 = vld [vmem:[#allocation5 + $0x1b8] sm:$0xf] }
  0x6c   :  { %2050 = vmatpush.bf16.msra.mxu2 %v3930_v56  ;;  %v3213_v56 = vld [vmem:[#allocation5 + $0x158] sm:$0xf]  ;;  %v4475_v15 = vld [vmem:[#allocation5 + $0x1cc] sm:$0xf0]  ;;  %v3237_v27 = vld [vmem:[#allocation5 + $0x188] sm:$0xf] }
  0x6d   :  { %2064 = vmatpush.bf16.msra.mxu3 %v4122_v61  ;;  %v3426_v61 = vor.u32 %v4513_v44, %v3423_v46  ;;  %v3717_v44 = vld [vmem:[#allocation5 + $0x548] sm:$0xf]  ;;  %v3262_v25 = vor.u32 %v4475_v15, %v3261_v13  ;;  %v4469_v28 = vld [vmem:[#allocation5 + $0x19c] sm:$0xf0]  ;;  %v4460_v41 = vld [vmem:[#allocation5 + $0x15c] sm:$0xf] }
  0x6e   :  { %2023 = vmatpush.bf16.msra.mxu0 %v3522_v3  ;;  %v4607_v3 = vld [vmem:[#allocation5 + $0x5ec] sm:$0xf0]  ;;  %v3429_v29 = vld [vmem:[#allocation5 + $0x308] sm:$0xf]  ;;  %v3215_v42 = vld [vmem:[#allocation5 + $0x170] sm:$0xf0]  ;;  %v3238_v43 = vor.u32 %v4469_v28, %v3237_v27 }
  0x6f   :  { %2037 = vmatpush.bf16.msra.mxu1 %v3714_v4  ;;  %v4002_v4 = vor.u32 %v4657_v53, %v3999_v55  ;;  %v3790_v12 = vor.u32 %v4607_v3, %v3789_v2  ;;  %v4487_v53 = vld [vmem:[#allocation5 + $0x22c] sm:$0xf0]  ;;  %v4481_v2 = vld [vmem:[#allocation5 + $0x1fc] sm:$0xf0]  ;;  %v3477_v3 = vld [vmem:[#allocation5 + $0x368] sm:$0xf] }
  0x70   :  { %2051 = vmatpush.bf16.msra.mxu2 %v3906_v5  ;;  %v3214_v5 = vor.u32 %v4463_v58, %v3213_v56  ;;  %v4535_v55 = vld [vmem:[#allocation5 + $0x3ac] sm:$0xf0]  ;;  %v3693_v56 = vld [vmem:[#allocation5 + $0x518] sm:$0xf]  ;;  %v3310_v60 = vor.u32 %v4487_v53, %v3309_v51  ;;  %v3957_v51 = vld [vmem:[#allocation5 + $0x728] sm:$0xf] }
  0x71   :  { %2065 = vmatpush.bf16.msra.mxu3 %v4098_v10  ;;  %v4457_v10 = vld [vmem:[#allocation5 + $0x13c] sm:$0xf0]  ;;  %v4583_v58 = vld [vmem:[#allocation5 + $0x52c] sm:$0xf0]  ;;  %v4149_v53 = vld [vmem:[#allocation5 + $0x8a8] sm:$0xf] }
  0x72   :  { %2024 = vmatpush.bf16.msra.mxu0 %v3498_v16  ;;  %v3765_v16 = vld [vmem:[#allocation5 + $0x5a8] sm:$0xf]  ;;  %v3885_v27 = vld [vmem:[#allocation5 + $0x698] sm:$0xf]  ;;  %v4631_v28 = vld [vmem:[#allocation5 + $0x6ac] sm:$0xf0] }
  0x73   :  { %2038 = vmatpush.bf16.msra.mxu1 %v3690_v17  ;;  %v4601_v17 = vld [vmem:[#allocation5 + $0x5bc] sm:$0xf0]  ;;  %v3909_v13 = vld [vmem:[#allocation5 + $0x6c8] sm:$0xf]  ;;  %s5014_s4 = smov [#allocation14]   ;;  %s2995_s14 = sshll.u32 %s5216_s7, 4  ;;  %s2996_s14 = int_to_ptr.hbm [resolvable:$true] %s2995_s14 }
  0x74   :  { %2052 = vmatpush.bf16.msra.mxu2 %v3882_v18  ;;  %v3190_v18 = vor.u32 %v4457_v10, %v3189_v9  ;;  %v3766_v26 = vor.u32 %v4601_v17, %v3765_v16  ;;  %v3453_v16 = vld [vmem:[#allocation5 + $0x338] sm:$0xf]  ;;  %v4523_v17 = vld [vmem:[#allocation5 + $0x34c] sm:$0xf0]  ;;  %v4101_v15 = vld [vmem:[#allocation5 + $0x848] sm:$0xf] }
  0x75   :  { %2066 = vmatpush.bf16.msra.mxu3 %v4074_v24  ;;  %v4451_v24 = vld [vmem:[#allocation5 + $0x10c] sm:$0xf0]  ;;  %s2993_s6 = sshll.u32 %s5014_s4, 4  ;;  %s5015_s15 = smov 128   ;;  %s2994_s6 = int_to_ptr.vmem [resolvable:$true] %s2993_s6 }
  0x76   :  { %2025 = vmatpush.bf16.msra.mxu0 %v3474_v30  ;;  %v3741_v30 = vld [vmem:[#allocation5 + $0x578] sm:$0xf]  ;;  %s5016_s1 = smov 8  }
  0x77   :  { %2039 = vmatpush.bf16.msra.mxu1 %v3666_v31  ;;  %v4595_v31 = vld [vmem:[#allocation5 + $0x58c] sm:$0xf0] }
  0x78   :  { %2053 = vmatpush.bf16.msra.mxu2 %v3858_v32  ;;  %v3166_v32 = vor.u32 %v4451_v24, %v3165_v21  ;;  %v3742_v40 = vor.u32 %v4595_v31, %v3741_v30  ;;  %v3045_v21 = vld [vmem:[#allocation5 + $0x8] sm:$0xf]  ;;  %v4421_v24 = vld [vmem:[#allocation5 + $0x1c] sm:$0xf0] }
  0x79   :  { %2067 = vmatpush.bf16.msra.mxu3 %v4050_v37  ;;  %v4445_v37 = vld [vmem:[#allocation5 + $0xdc] sm:$0xf0]  ;;  %v3046_v38 = vor.u32 %v4421_v24, %v3045_v21  ;;  %v3335_v21 = vld [vmem:[#allocation5 + $0x260] sm:$0xf0] }
  0x7a   :  { %2026 = vmatpush.bf16.msra.mxu0 %v3450_v45  ;;  %v4589_v45 = vld [vmem:[#allocation5 + $0x55c] sm:$0xf0]  ;;  %v3142_v46 = vor.u32 %v4445_v37, %v3141_v36  ;;  %v4655_v36 = vld [vmem:[#allocation5 + $0x76c] sm:$0xf0]  ;;  %v4173_v37 = vld [vmem:[#allocation5 + $0x8d8] sm:$0xf] }
  0x7b   :  { %2040 = vmatpush.bf16.msra.mxu1 %v3642_v49  ;;  %v3117_v49 = vld [vmem:[#allocation5 + $0x98] sm:$0xf]  ;;  %v3718_v52 = vor.u32 %v4589_v45, %v3717_v44  ;;  %v4517_v31 = vld [vmem:[#allocation5 + $0x31c] sm:$0xf0]  ;;  %v4508_v45 = vld [vmem:[#allocation5 + $0x2dc] sm:$0xf] }
  0x7c   :  { %2054 = vmatpush.bf16.msra.mxu2 %v3834_v50  ;;  %v4439_v50 = vld [vmem:[#allocation5 + $0xac] sm:$0xf0]  ;;  %v3430_v44 = vor.u32 %v4517_v31, %v3429_v29  ;;  %v4077_v29 = vld [vmem:[#allocation5 + $0x818] sm:$0xf] }
  0x7d   :  { %2068 = vmatpush.bf16.msra.mxu3 %v4026_v54  ;;  %v3501_v54 = vld [vmem:[#allocation5 + $0x398] sm:$0xf]  ;;  %v3118_v59 = vor.u32 %v4439_v50, %v3117_v49  ;;  %v3218_v50 = vor.u32 %v4460_v41, %v3215_v42  ;;  %v4679_v31 = vld [vmem:[#allocation5 + $0x82c] sm:$0xf0]  ;;  %v3861_v41 = vld [vmem:[#allocation5 + $0x668] sm:$0xf] }
  0x7e   :  { %2027 = vmatpush.bf16.msra.mxu0 %v3426_v61  ;;  %v3502_v61 = vor.u32 %v4535_v55, %v3501_v54  ;;  %v4697_v55 = vld [vmem:[#allocation5 + $0x8bc] sm:$0xf0] }
  0x7f   :  { %2041 = vmatpush.bf16.msra.mxu1 %v3618_v0  ;;  %v3285_v0 = vld [vmem:[#allocation5 + $0x1e8] sm:$0xf]  ;;  %v4625_v42 = vld [vmem:[#allocation5 + $0x67c] sm:$0xf0] }
  0x80   :  { %2055 = vmatpush.bf16.msra.mxu2 %v3810_v1  ;;  %v3694_v1 = vor.u32 %v4583_v58, %v3693_v56  ;;  %v3286_v9 = vor.u32 %v4481_v2, %v3285_v0  ;;  %v4454_v56 = vld [vmem:[#allocation5 + $0x12c] sm:$0xf]  ;;  %v3191_v58 = vld [vmem:[#allocation5 + $0x140] sm:$0xf0]  ;;  %v3933_v0 = vld [vmem:[#allocation5 + $0x6f8] sm:$0xf] }
  0x81   :  { %2069 = vmatpush.bf16.msra.mxu3 %v4002_v4  ;;  %2028 = vmatmul.bf16.vlgmr.msra.gmra.mxu0 %v5084_v22  ;;  %v4529_v4 = vld [vmem:[#allocation5 + $0x37c] sm:$0xf0]  ;;  %v4125_v2 = vld [vmem:[#allocation5 + $0x878] sm:$0xf] }
  0x82   :  { %2076 = vmatpush.bf16.msrb.mxu0 %v3214_v5  ;;  %2042 = vmatmul.bf16.vlgmr.msra.gmra.mxu1 %v5086_v23  ;;  %v3669_v5 = vld [vmem:[#allocation5 + $0x4e8] sm:$0xf]  ;;  %v3478_v10 = vor.u32 %v4529_v4, %v3477_v3  ;;  %v4691_v4 = vld [vmem:[#allocation5 + $0x88c] sm:$0xf0] }
  0x83   :  { %2090 = vmatpush.bf16.msrb.mxu1 %v3406_v7  ;;  %2056 = vmatmul.bf16.vlgmr.msra.gmra.mxu2 %v5090_v35  ;;  %v4577_v7 = vld [vmem:[#allocation5 + $0x4fc] sm:$0xf0] }
  0x84   :  { %2104 = vmatpush.bf16.msrb.mxu2 %v3598_v8  ;;  %2070 = vmatmul.bf16.vlgmr.msra.gmra.mxu3 %v5092_v39  ;;  %v3094_v8 = vor.u32 %v4433_v63, %v3093_v62  ;;  %v3670_v14 = vor.u32 %v4577_v7, %v3669_v5  ;;  %v4150_v62 = vor.u32 %v4697_v55, %v4149_v53  ;;  %v4448_v5 = vld [vmem:[#allocation5 + $0xfc] sm:$0xf]  ;;  %v3167_v7 = vld [vmem:[#allocation5 + $0x110] sm:$0xf0]  ;;  %v3837_v53 = vld [vmem:[#allocation5 + $0x638] sm:$0xf] }
  0x85   :  { %2118 = vmatpush.bf16.msrb.mxu3 %v3790_v12  ;;  %v4427_v12 = vld [vmem:[#allocation5 + $0x4c] sm:$0xf0]  ;;  %v3194_v63 = vor.u32 %v4454_v56, %v3191_v58  ;;  %v4029_v55 = vld [vmem:[#allocation5 + $0x7b8] sm:$0xf] }
  0x86   :  { %2077 = vmatpush.bf16.msrb.mxu0 %v3190_v18  ;;  %v3645_v18 = vld [vmem:[#allocation5 + $0x4b8] sm:$0xf]  ;;  %v4667_v58 = vld [vmem:[#allocation5 + $0x7cc] sm:$0xf0] }
  0x87   :  { %2091 = vmatpush.bf16.msrb.mxu1 %v3382_v19  ;;  %v4571_v19 = vld [vmem:[#allocation5 + $0x4cc] sm:$0xf0] }
  0x88   :  { %2105 = vmatpush.bf16.msrb.mxu2 %v3574_v20  ;;  %v3070_v20 = vor.u32 %v4427_v12, %v3069_v11  ;;  %v3646_v30 = vor.u32 %v4571_v19, %v3645_v18  ;;  %v4126_v11 = vor.u32 %v4691_v4, %v4125_v2  ;;  %v3170_v12 = vor.u32 %v4448_v5, %v3167_v7  ;;  %v4442_v18 = vld [vmem:[#allocation5 + $0xcc] sm:$0xf]  ;;  %v3143_v19 = vld [vmem:[#allocation5 + $0xe0] sm:$0xf0]  ;;  %v4005_v4 = vld [vmem:[#allocation5 + $0x788] sm:$0xf] }
  0x89   :  { %2119 = vmatpush.bf16.msrb.mxu3 %v3766_v26  ;;  %v3454_v26 = vor.u32 %v4523_v17, %v3453_v16  ;;  %v4685_v17 = vld [vmem:[#allocation5 + $0x85c] sm:$0xf0]  ;;  %v4030_v2 = vor.u32 %v4667_v58, %v4029_v55  ;;  %v4418_v7 = vld [vmem:[#allocation5 + $0xc] sm:$0xf] }
  0x8a   :  { %2078 = vmatpush.bf16.msrb.mxu0 %v3166_v32  ;;  %v3621_v32 = vld [vmem:[#allocation5 + $0x488] sm:$0xf]  ;;  %v4661_v5 = vld [vmem:[#allocation5 + $0x79c] sm:$0xf0]  ;;  %v4538_v55 = vld [vmem:[#allocation5 + $0x3cc] sm:$0xf] }
  0x8b   :  { %2092 = vmatpush.bf16.msrb.mxu1 %v3358_v33  ;;  %v4565_v33 = vld [vmem:[#allocation5 + $0x49c] sm:$0xf0]  ;;  %v4586_v58 = vld [vmem:[#allocation5 + $0x54c] sm:$0xf] }
  0x8c   :  { %2106 = vmatpush.bf16.msrb.mxu2 %v3550_v34  ;;  %v3981_v34 = vld [vmem:[#allocation5 + $0x758] sm:$0xf] }
  0x8d   :  { %2120 = vmatpush.bf16.msrb.mxu3 %v3742_v40  ;;  %v4703_v40 = vld [vmem:[#allocation5 + $0x8ec] sm:$0xf0] }
  0x8e   :  { %2079 = vmatpush.bf16.msrb.mxu0 %v3142_v46  ;;  %v3407_v46 = vld [vmem:[#allocation5 + $0x2f0] sm:$0xf0]  ;;  %v4174_v49 = vor.u32 %v4703_v40, %v4173_v37  ;;  %v3886_v37 = vor.u32 %v4631_v28, %v3885_v27 }
  0x8f   :  { %2093 = vmatpush.bf16.msrb.mxu1 %v3334_v47  ;;  %v3622_v47 = vor.u32 %v4565_v33, %v3621_v32  ;;  %v3410_v54 = vor.u32 %v4508_v45, %v3407_v46  ;;  %v4436_v32 = vld [vmem:[#allocation5 + $0x9c] sm:$0xf]  ;;  %v3119_v33 = vld [vmem:[#allocation5 + $0xb0] sm:$0xf0]  ;;  %v4673_v45 = vld [vmem:[#allocation5 + $0x7fc] sm:$0xf0] }
  0x90   :  { %2107 = vmatpush.bf16.msrb.mxu2 %v3526_v48  ;;  %v3982_v48 = vor.u32 %v4655_v36, %v3981_v34  ;;  %v4484_v34 = vld [vmem:[#allocation5 + $0x21c] sm:$0xf]  ;;  %v3311_v36 = vld [vmem:[#allocation5 + $0x230] sm:$0xf0]  ;;  %v3122_v40 = vor.u32 %v4436_v32, %v3119_v33  ;;  %v4430_v46 = vld [vmem:[#allocation5 + $0x6c] sm:$0xf] }
  0x91   :  { %2121 = vmatpush.bf16.msrb.mxu3 %v3718_v52  ;;  %v4649_v52 = vld [vmem:[#allocation5 + $0x73c] sm:$0xf0]  ;;  %v3767_v33 = vld [vmem:[#allocation5 + $0x5c0] sm:$0xf0] }
  0x92   :  { %2080 = vmatpush.bf16.msrb.mxu0 %v3118_v59  ;;  %v4502_v59 = vld [vmem:[#allocation5 + $0x2ac] sm:$0xf] }
  0x93   :  { %2094 = vmatpush.bf16.msrb.mxu1 %v3310_v60  ;;  %v3383_v60 = vld [vmem:[#allocation5 + $0x2c0] sm:$0xf0] }
  0x94   :  { %2108 = vmatpush.bf16.msrb.mxu2 %v3502_v61  ;;  %v3958_v61 = vor.u32 %v4649_v52, %v3957_v51  ;;  %v3386_v3 = vor.u32 %v4502_v59, %v3383_v60  ;;  %v4424_v59 = vld [vmem:[#allocation5 + $0x3c] sm:$0xf]  ;;  %v3071_v60 = vld [vmem:[#allocation5 + $0x50] sm:$0xf0] }
  0x95   :  { %2122 = vmatpush.bf16.msrb.mxu3 %v3694_v1  ;;  %v4643_v1 = vld [vmem:[#allocation5 + $0x70c] sm:$0xf0] }
  0x96   :  { %2081 = vmatpush.bf16.msrb.mxu0 %v3094_v8  ;;  %v4496_v8 = vld [vmem:[#allocation5 + $0x27c] sm:$0xf] }
  0x97   :  { %2095 = vmatpush.bf16.msrb.mxu1 %v3286_v9  ;;  %v3359_v9 = vld [vmem:[#allocation5 + $0x290] sm:$0xf0] }
  0x98   :  { %2109 = vmatpush.bf16.msrb.mxu2 %v3478_v10  ;;  %v3934_v10 = vor.u32 %v4643_v1, %v3933_v0  ;;  %v3362_v16 = vor.u32 %v4496_v8, %v3359_v9  ;;  %v3813_v0 = vld [vmem:[#allocation5 + $0x608] sm:$0xf]  ;;  %v4613_v1 = vld [vmem:[#allocation5 + $0x61c] sm:$0xf0]  ;;  %v3047_v9 = vld [vmem:[#allocation5 + $0x20] sm:$0xf0] }
  0x99   :  { %2123 = vmatpush.bf16.msrb.mxu3 %v3670_v14  ;;  %v4637_v14 = vld [vmem:[#allocation5 + $0x6dc] sm:$0xf0] }
  0x9a   :  { %2082 = vmatpush.bf16.msrb.mxu0 %v3070_v20  ;;  %v4490_v20 = vld [vmem:[#allocation5 + $0x24c] sm:$0xf]  ;;  %v3910_v24 = vor.u32 %v4637_v14, %v3909_v13  ;;  %v3599_v13 = vld [vmem:[#allocation5 + $0x470] sm:$0xf0]  ;;  %v4604_v14 = vld [vmem:[#allocation5 + $0x5dc] sm:$0xf] }
  0x9b   :  { %2096 = vmatpush.bf16.msrb.mxu1 %v3262_v25  ;;  %v4102_v25 = vor.u32 %v4685_v17, %v4101_v15  ;;  %v3814_v15 = vor.u32 %v4613_v1, %v3813_v0  ;;  %v4652_v17 = vld [vmem:[#allocation5 + $0x75c] sm:$0xf]  ;;  %v4103_v0 = vld [vmem:[#allocation5 + $0x860] sm:$0xf0] }
  0x9c   :  { %2110 = vmatpush.bf16.msrb.mxu2 %v3454_v26  ;;  %v3146_v26 = vor.u32 %v4442_v18, %v3143_v19  ;;  %v3983_v18 = vld [vmem:[#allocation5 + $0x770] sm:$0xf0]  ;;  %v4006_v19 = vor.u32 %v4661_v5, %v4005_v4  ;;  %v4532_v4 = vld [vmem:[#allocation5 + $0x39c] sm:$0xf] }
  0x9d   :  { %2124 = vmatpush.bf16.msrb.mxu3 %v3646_v30  ;;  %v3338_v30 = vor.u32 %v4490_v20, %v3335_v21  ;;  %v3050_v20 = vor.u32 %v4418_v7, %v3047_v9  ;;  %v4700_v21 = vld [vmem:[#allocation5 + $0x8dc] sm:$0xf]  ;;  %v3986_v28 = vor.u32 %v4652_v17, %v3983_v18  ;;  %v3503_v5 = vld [vmem:[#allocation5 + $0x3b0] sm:$0xf0]  ;;  %v4526_v17 = vld [vmem:[#allocation5 + $0x36c] sm:$0xf] }
  0x9e   :  { %2083 = vmatpush.bf16.msrb.mxu0 %v3046_v38  ;;  %v4078_v38 = vor.u32 %v4679_v31, %v4077_v29  ;;  %v4550_v29 = vld [vmem:[#allocation5 + $0x42c] sm:$0xf]  ;;  %v4580_v7 = vld [vmem:[#allocation5 + $0x51c] sm:$0xf]  ;;  %v3695_v9 = vld [vmem:[#allocation5 + $0x530] sm:$0xf0] }
  0x9f   :  { %2097 = vmatpush.bf16.msrb.mxu1 %v3238_v43  ;;  %v4053_v43 = vld [vmem:[#allocation5 + $0x7e8] sm:$0xf]  ;;  %v4598_v31 = vld [vmem:[#allocation5 + $0x5ac] sm:$0xf]  ;;  %v3479_v18 = vld [vmem:[#allocation5 + $0x380] sm:$0xf0] }
  0xa0   :  { %2111 = vmatpush.bf16.msrb.mxu2 %v3430_v44  ;;  %v3314_v44 = vor.u32 %v4484_v34, %v3311_v36  ;;  %v4054_v51 = vor.u32 %v4673_v45, %v4053_v43  ;;  %v4646_v34 = vld [vmem:[#allocation5 + $0x72c] sm:$0xf]  ;;  %v3959_v36 = vld [vmem:[#allocation5 + $0x740] sm:$0xf0]  ;;  %v4544_v43 = vld [vmem:[#allocation5 + $0x3fc] sm:$0xf] }
  0xa1   :  { %2125 = vmatpush.bf16.msrb.mxu3 %v3622_v47  ;;  %2084 = vmatmul.bf16.vlgmr.msrb.gmra.mxu0 %v5078_v57  ;;  %v3095_v47 = vld [vmem:[#allocation5 + $0x80] sm:$0xf0]  ;;  %v4592_v45 = vld [vmem:[#allocation5 + $0x57c] sm:$0xf] }
  0xa2   :  { %2132 = vmatpush.bf16.msra.mxu0 %v3982_v48  ;;  %2098 = vmatmul.bf16.vlgmr.msrb.gmra.mxu1 %v5081_v6  ;;  %v4478_v48 = vld [vmem:[#allocation5 + $0x1ec] sm:$0xf]  ;;  %v3098_v52 = vor.u32 %v4430_v46, %v3095_v47  ;;  %v3743_v47 = vld [vmem:[#allocation5 + $0x590] sm:$0xf0] }
  0xa3   :  { %2146 = vmatpush.bf16.msra.mxu1 %v4174_v49  ;;  %2112 = vmatmul.bf16.vlgmr.msrb.gmra.mxu2 %v5084_v22  ;;  %v3287_v49 = vld [vmem:[#allocation5 + $0x200] sm:$0xf0] }
  0xa4   :  { %2160 = vmatpush.bf16.msra.mxu2 %v3218_v50  ;;  %2126 = vmatmul.bf16.vlgmr.msrb.gmra.mxu3 %v5086_v23  ;;  %v3862_v50 = vor.u32 %v4625_v42, %v3861_v41  ;;  %v3290_v56 = vor.u32 %v4478_v48, %v3287_v49  ;;  %v3770_v41 = vor.u32 %v4598_v31, %v3767_v33  ;;  %v4640_v48 = vld [vmem:[#allocation5 + $0x6fc] sm:$0xf]  ;;  %v3935_v49 = vld [vmem:[#allocation5 + $0x710] sm:$0xf0] }
  0xa5   :  { %2174 = vmatpush.bf16.msra.mxu3 %v3410_v54  ;;  %v4619_v54 = vld [vmem:[#allocation5 + $0x64c] sm:$0xf0]  ;;  %v3962_v42 = vor.u32 %v4646_v34, %v3959_v36  ;;  %v4520_v31 = vld [vmem:[#allocation5 + $0x33c] sm:$0xf]  ;;  %v3647_v36 = vld [vmem:[#allocation5 + $0x4d0] sm:$0xf0] }
  0xa6   :  { %2133 = vmatpush.bf16.msra.mxu0 %v3958_v61  ;;  %v4472_v61 = vld [vmem:[#allocation5 + $0x1bc] sm:$0xf] }
  0xa7   :  { %2147 = vmatpush.bf16.msra.mxu1 %v4150_v62  ;;  %v3263_v62 = vld [vmem:[#allocation5 + $0x1d0] sm:$0xf0]  ;;  %v4568_v33 = vld [vmem:[#allocation5 + $0x4bc] sm:$0xf] }
  0xa8   :  { %2161 = vmatpush.bf16.msra.mxu2 %v3194_v63  ;;  %v3838_v63 = vor.u32 %v4619_v54, %v3837_v53  ;;  %v3266_v8 = vor.u32 %v4472_v61, %v3263_v62  ;;  %v3746_v53 = vor.u32 %v4592_v45, %v3743_v47  ;;  %v3938_v54 = vor.u32 %v4640_v48, %v3935_v49  ;;  %v4634_v61 = vld [vmem:[#allocation5 + $0x6cc] sm:$0xf]  ;;  %v3911_v62 = vld [vmem:[#allocation5 + $0x6e0] sm:$0xf0] }
  0xa9   :  { %2175 = vmatpush.bf16.msra.mxu3 %v3386_v3  ;;  %v3074_v3 = vor.u32 %v4424_v59, %v3071_v60  ;;  %v3719_v60 = vld [vmem:[#allocation5 + $0x560] sm:$0xf0]  ;;  %v3650_v45 = vor.u32 %v4568_v33, %v3647_v36  ;;  %v4562_v47 = vld [vmem:[#allocation5 + $0x48c] sm:$0xf]  ;;  %v3149_v33 = vld [vmem:[#allocation5 + $0xd0] sm:$0xf] }
  0xaa   :  { %2134 = vmatpush.bf16.msra.mxu0 %v3934_v10  ;;  %v4466_v10 = vld [vmem:[#allocation5 + $0x18c] sm:$0xf]  ;;  %v3623_v48 = vld [vmem:[#allocation5 + $0x4a0] sm:$0xf0]  ;;  %v3341_v36 = vld [vmem:[#allocation5 + $0x250] sm:$0xf] }
  0xab   :  { %2148 = vmatpush.bf16.msra.mxu1 %v4126_v11  ;;  %v3239_v11 = vld [vmem:[#allocation5 + $0x1a0] sm:$0xf0]  ;;  %v4610_v49 = vld [vmem:[#allocation5 + $0x60c] sm:$0xf] }
  0xac   :  { %2162 = vmatpush.bf16.msra.mxu2 %v3170_v12  ;;  %v4556_v12 = vld [vmem:[#allocation5 + $0x45c] sm:$0xf] }
  0xad   :  { %2176 = vmatpush.bf16.msra.mxu3 %v3362_v16  ;;  %v3791_v16 = vld [vmem:[#allocation5 + $0x5f0] sm:$0xf0] }
  0xae   :  { %2135 = vmatpush.bf16.msra.mxu0 %v3910_v24  ;;  %v4175_v24 = vld [vmem:[#allocation5 + $0x8f0] sm:$0xf0]  ;;  %v3794_v27 = vor.u32 %v4604_v14, %v3791_v16  ;;  %v3506_v14 = vor.u32 %v4532_v4, %v3503_v5 }
  0xaf   :  { %2149 = vmatpush.bf16.msra.mxu1 %v4102_v25  ;;  %v3242_v25 = vor.u32 %v4466_v10, %v3239_v11  ;;  %v4178_v32 = vor.u32 %v4700_v21, %v4175_v24  ;;  %v4628_v10 = vld [vmem:[#allocation5 + $0x69c] sm:$0xf]  ;;  %v3887_v11 = vld [vmem:[#allocation5 + $0x6b0] sm:$0xf0]  ;;  %v3671_v21 = vld [vmem:[#allocation5 + $0x500] sm:$0xf0] }
  0xb0   :  { %2163 = vmatpush.bf16.msra.mxu2 %v3146_v26  ;;  %v3602_v26 = vor.u32 %v4556_v12, %v3599_v13  ;;  %v4676_v12 = vld [vmem:[#allocation5 + $0x81c] sm:$0xf]  ;;  %v4079_v13 = vld [vmem:[#allocation5 + $0x830] sm:$0xf0]  ;;  %v3890_v16 = vor.u32 %v4628_v10, %v3887_v11  ;;  %v4622_v24 = vld [vmem:[#allocation5 + $0x66c] sm:$0xf] }
  0xb1   :  { %2177 = vmatpush.bf16.msra.mxu3 %v3338_v30  ;;  %v3575_v30 = vld [vmem:[#allocation5 + $0x440] sm:$0xf0]  ;;  %v4506_v11 = vld [vmem:[#allocation5 + $0x2c4] sm:$0xf0] }
  0xb2   :  { %2136 = vmatpush.bf16.msra.mxu0 %v3886_v37  ;;  %v4694_v37 = vld [vmem:[#allocation5 + $0x8ac] sm:$0xf] }
  0xb3   :  { %2150 = vmatpush.bf16.msra.mxu1 %v4078_v38  ;;  %v4151_v38 = vld [vmem:[#allocation5 + $0x8c0] sm:$0xf0] }
  0xb4   :  { %2164 = vmatpush.bf16.msra.mxu2 %v3122_v40  ;;  %v3578_v40 = vor.u32 %v4550_v29, %v3575_v30  ;;  %v4154_v46 = vor.u32 %v4694_v37, %v4151_v38  ;;  %v4616_v37 = vld [vmem:[#allocation5 + $0x63c] sm:$0xf]  ;;  %v3839_v38 = vld [vmem:[#allocation5 + $0x650] sm:$0xf0] }
  0xb5   :  { %2178 = vmatpush.bf16.msra.mxu3 %v3314_v44  ;;  %v3551_v44 = vld [vmem:[#allocation5 + $0x410] sm:$0xf0] }
  0xb6   :  { %2137 = vmatpush.bf16.msra.mxu0 %v3862_v50  ;;  %v4688_v50 = vld [vmem:[#allocation5 + $0x87c] sm:$0xf] }
  0xb7   :  { %2151 = vmatpush.bf16.msra.mxu1 %v4054_v51  ;;  %v4127_v51 = vld [vmem:[#allocation5 + $0x890] sm:$0xf0] }
  0xb8   :  { %2165 = vmatpush.bf16.msra.mxu2 %v3098_v52  ;;  %v3554_v52 = vor.u32 %v4544_v43, %v3551_v44  ;;  %v4130_v59 = vor.u32 %v4688_v50, %v4127_v51  ;;  %v4514_v43 = vld [vmem:[#allocation5 + $0x30c] sm:$0xf]  ;;  %v3431_v44 = vld [vmem:[#allocation5 + $0x320] sm:$0xf0] }
  0xb9   :  { %2179 = vmatpush.bf16.msra.mxu3 %v3290_v56  ;;  %v3527_v56 = vld [vmem:[#allocation5 + $0x3e0] sm:$0xf0] }
  0xba   :  { %2138 = vmatpush.bf16.msra.mxu0 %v3838_v63  ;;  %v4682_v63 = vld [vmem:[#allocation5 + $0x84c] sm:$0xf]  ;;  %v3530_v1 = vor.u32 %v4538_v55, %v3527_v56  ;;  %v3815_v51 = vld [vmem:[#allocation5 + $0x620] sm:$0xf0]  ;;  %v4464_v55 = vld [vmem:[#allocation5 + $0x174] sm:$0xf0] }
  0xbb   :  { %2152 = vmatpush.bf16.msra.mxu1 %v4030_v2  ;;  %v3722_v2 = vor.u32 %v4586_v58, %v3719_v60  ;;  %v3413_v56 = vld [vmem:[#allocation5 + $0x2e0] sm:$0xf]  ;;  %v3434_v58 = vor.u32 %v4514_v43, %v3431_v44  ;;  %v4590_v43 = vld [vmem:[#allocation5 + $0x564] sm:$0xf0] }
  0xbc   :  { %2166 = vmatpush.bf16.msra.mxu2 %v3074_v3  ;;  %v3914_v3 = vor.u32 %v4634_v61, %v3911_v62  ;;  %v3605_v60 = vld [vmem:[#allocation5 + $0x460] sm:$0xf]  ;;  %v4560_v61 = vld [vmem:[#allocation5 + $0x474] sm:$0xf0]  ;;  %v3626_v62 = vor.u32 %v4562_v47, %v3623_v48 }
  0xbd   :  { %2180 = vmatpush.bf16.msra.mxu3 %v3266_v8  ;;  %v4106_v8 = vor.u32 %v4682_v63, %v4103_v0  ;;  %v3818_v63 = vor.u32 %v4610_v49, %v3815_v51  ;;  %v3797_v0 = vld [vmem:[#allocation5 + $0x5e0] sm:$0xf]  ;;  %v3606_v5 = vor.u32 %v4560_v61, %v3605_v60  ;;  %v4440_v48 = vld [vmem:[#allocation5 + $0xb4] sm:$0xf0]  ;;  %v3101_v60 = vld [vmem:[#allocation5 + $0x70] sm:$0xf] }
  0xbe   :  { %2139 = vmatpush.bf16.msra.mxu0 %v3814_v15  ;;  %v3698_v15 = vor.u32 %v4580_v7, %v3695_v9  ;;  %v3197_v7 = vld [vmem:[#allocation5 + $0x130] sm:$0xf]  ;;  %v3125_v47 = vld [vmem:[#allocation5 + $0xa0] sm:$0xf]  ;;  %v4488_v51 = vld [vmem:[#allocation5 + $0x234] sm:$0xf0] }
  0xbf   :  { %2153 = vmatpush.bf16.msra.mxu1 %v4006_v19  ;;  %v4574_v19 = vld [vmem:[#allocation5 + $0x4ec] sm:$0xf]  ;;  %v3389_v9 = vld [vmem:[#allocation5 + $0x2b0] sm:$0xf]  ;;  %v3317_v49 = vld [vmem:[#allocation5 + $0x220] sm:$0xf] }
  0xc0   :  { %2167 = vmatpush.bf16.msra.mxu2 %v3050_v20  ;;  %v4082_v20 = vor.u32 %v4676_v12, %v4079_v13  ;;  %v3674_v29 = vor.u32 %v4574_v19, %v3671_v21  ;;  %v3581_v12 = vld [vmem:[#allocation5 + $0x430] sm:$0xf]  ;;  %v4554_v13 = vld [vmem:[#allocation5 + $0x444] sm:$0xf0]  ;;  %v3173_v19 = vld [vmem:[#allocation5 + $0x100] sm:$0xf] }
  0xc1   :  { %2181 = vmatpush.bf16.msra.mxu3 %v3242_v25  ;;  %2140 = vmatmul.bf16.vlgmr.msra.gmra.mxu0 %v5090_v35  ;;  %v3863_v25 = vld [vmem:[#allocation5 + $0x680] sm:$0xf0]  ;;  %v3365_v21 = vld [vmem:[#allocation5 + $0x280] sm:$0xf]  ;;  %v4434_v61 = vld [vmem:[#allocation5 + $0x84] sm:$0xf0] }
  0xc2   :  { %2188 = vmatpush.bf16.msrb.mxu0 %v3602_v26  ;;  %2154 = vmatmul.bf16.vlgmr.msra.gmra.mxu1 %v5092_v39  ;;  %v4670_v26 = vld [vmem:[#allocation5 + $0x7ec] sm:$0xf]  ;;  %v3866_v30 = vor.u32 %v4622_v24, %v3863_v25  ;;  %v4500_v25 = vld [vmem:[#allocation5 + $0x294] sm:$0xf0] }
  0xc3   :  { %2202 = vmatpush.bf16.msrb.mxu1 %v3794_v27  ;;  %2168 = vmatmul.bf16.vlgmr.msra.gmra.mxu2 %v5078_v57  ;;  %v4055_v27 = vld [vmem:[#allocation5 + $0x800] sm:$0xf0] }
  0xc4   :  { %2216 = vmatpush.bf16.msrb.mxu2 %v3986_v28  ;;  %2182 = vmatmul.bf16.vlgmr.msra.gmra.mxu3 %v5081_v6  ;;  %v3482_v28 = vor.u32 %v4526_v17, %v3479_v18  ;;  %v4058_v34 = vor.u32 %v4670_v26, %v4055_v27  ;;  %v3390_v17 = vor.u32 %v4506_v11, %v3389_v9  ;;  %v3557_v26 = vld [vmem:[#allocation5 + $0x400] sm:$0xf]  ;;  %v4548_v27 = vld [vmem:[#allocation5 + $0x414] sm:$0xf0] }
  0xc5   :  { %2230 = vmatpush.bf16.msrb.mxu3 %v4178_v32  ;;  %v3455_v32 = vld [vmem:[#allocation5 + $0x350] sm:$0xf0]  ;;  %v3582_v18 = vor.u32 %v4554_v13, %v3581_v12  ;;  %v3077_v9 = vld [vmem:[#allocation5 + $0x40] sm:$0xf]  ;;  %v4476_v13 = vld [vmem:[#allocation5 + $0x1d4] sm:$0xf0] }
  0xc6   :  { %2189 = vmatpush.bf16.msrb.mxu0 %v3578_v40  ;;  %v4664_v40 = vld [vmem:[#allocation5 + $0x7bc] sm:$0xf]  ;;  %v3269_v11 = vld [vmem:[#allocation5 + $0x1c0] sm:$0xf] }
  0xc7   :  { %2203 = vmatpush.bf16.msrb.mxu1 %v3770_v41  ;;  %v4031_v41 = vld [vmem:[#allocation5 + $0x7d0] sm:$0xf0] }
  0xc8   :  { %2217 = vmatpush.bf16.msrb.mxu2 %v3962_v42  ;;  %v3458_v42 = vor.u32 %v4520_v31, %v3455_v32  ;;  %v4034_v50 = vor.u32 %v4664_v40, %v4031_v41  ;;  %v3366_v31 = vor.u32 %v4500_v25, %v3365_v21  ;;  %v3558_v32 = vor.u32 %v4548_v27, %v3557_v26  ;;  %v3533_v40 = vld [vmem:[#allocation5 + $0x3d0] sm:$0xf]  ;;  %v4542_v41 = vld [vmem:[#allocation5 + $0x3e4] sm:$0xf0]  ;;  %v5114_v21 = vpop.f32.mrf.mxu0 }
  0xc9   :  { %2231 = vmatpush.bf16.msrb.mxu3 %v4154_v46  ;;  %v3842_v46 = vor.u32 %v4616_v37, %v3839_v38  ;;  %v4494_v38 = vld [vmem:[#allocation5 + $0x264] sm:$0xf0]  ;;  %v3245_v26 = vld [vmem:[#allocation5 + $0x190] sm:$0xf] }
  0xca   :  { %2190 = vmatpush.bf16.msrb.mxu0 %v3554_v52  ;;  %v4658_v52 = vld [vmem:[#allocation5 + $0x78c] sm:$0xf]  ;;  %v4470_v27 = vld [vmem:[#allocation5 + $0x1a4] sm:$0xf0] }
  0xcb   :  { %2204 = vmatpush.bf16.msrb.mxu1 %v3746_v53  ;;  %v4007_v53 = vld [vmem:[#allocation5 + $0x7a0] sm:$0xf0] }
  0xcc   :  { %2218 = vmatpush.bf16.msrb.mxu2 %v3938_v54  ;;  %v3221_v54 = vld [vmem:[#allocation5 + $0x160] sm:$0xf] }
  0xcd   :  { %2232 = vmatpush.bf16.msrb.mxu3 %v4130_v59  ;;  %v4512_v59 = vld [vmem:[#allocation5 + $0x2f4] sm:$0xf0] }
  0xce   :  { %2191 = vmatpush.bf16.msrb.mxu0 %v3530_v1  ;;  %v4608_v1 = vld [vmem:[#allocation5 + $0x5f4] sm:$0xf0]  ;;  %v3414_v4 = vor.u32 %v4512_v59, %v3413_v56  ;;  %v3126_v56 = vor.u32 %v4440_v48, %v3125_v47 }
  0xcf   :  { %2205 = vmatpush.bf16.msrb.mxu1 %v3722_v2  ;;  %v4010_v2 = vor.u32 %v4658_v52, %v4007_v53  ;;  %v3798_v10 = vor.u32 %v4608_v1, %v3797_v0  ;;  %v3509_v52 = vld [vmem:[#allocation5 + $0x3a0] sm:$0xf]  ;;  %v4536_v53 = vld [vmem:[#allocation5 + $0x3b4] sm:$0xf0]  ;;  %v4482_v0 = vld [vmem:[#allocation5 + $0x204] sm:$0xf0] }
  0xd0   :  { %2219 = vmatpush.bf16.msrb.mxu2 %v3914_v3  ;;  %v3222_v3 = vor.u32 %v4464_v55, %v3221_v54  ;;  %v3701_v54 = vld [vmem:[#allocation5 + $0x520] sm:$0xf]  ;;  %v4584_v55 = vld [vmem:[#allocation5 + $0x534] sm:$0xf0]  ;;  %v3510_v59 = vor.u32 %v4536_v53, %v3509_v52  ;;  %v3485_v1 = vld [vmem:[#allocation5 + $0x370] sm:$0xf] }
  0xd1   :  { %2233 = vmatpush.bf16.msrb.mxu3 %v4106_v8  ;;  %v4458_v8 = vld [vmem:[#allocation5 + $0x144] sm:$0xf0]  ;;  %v4157_v53 = vld [vmem:[#allocation5 + $0x8b0] sm:$0xf] }
  0xd2   :  { %2192 = vmatpush.bf16.msrb.mxu0 %v3506_v14  ;;  %v3773_v14 = vld [vmem:[#allocation5 + $0x5b0] sm:$0xf]  ;;  %v4650_v52 = vld [vmem:[#allocation5 + $0x744] sm:$0xf0] }
  0xd3   :  { %2206 = vmatpush.bf16.msrb.mxu1 %v3698_v15  ;;  %v4602_v15 = vld [vmem:[#allocation5 + $0x5c4] sm:$0xf0] }
  0xd4   :  { %2220 = vmatpush.bf16.msrb.mxu2 %v3890_v16  ;;  %v3198_v16 = vor.u32 %v4458_v8, %v3197_v7  ;;  %v3774_v24 = vor.u32 %v4602_v15, %v3773_v14  ;;  %v3461_v14 = vld [vmem:[#allocation5 + $0x340] sm:$0xf]  ;;  %v4524_v15 = vld [vmem:[#allocation5 + $0x354] sm:$0xf0] }
  0xd5   :  { %2234 = vmatpush.bf16.msrb.mxu3 %v4082_v20  ;;  %v4452_v20 = vld [vmem:[#allocation5 + $0x114] sm:$0xf0]  ;;  %v3462_v25 = vor.u32 %v4524_v15, %v3461_v14 }
  0xd6   :  { %2193 = vmatpush.bf16.msrb.mxu0 %v3482_v28  ;;  %v3749_v28 = vld [vmem:[#allocation5 + $0x580] sm:$0xf] }
  0xd7   :  { %2207 = vmatpush.bf16.msrb.mxu1 %v3674_v29  ;;  %v4596_v29 = vld [vmem:[#allocation5 + $0x594] sm:$0xf0] }
  0xd8   :  { %2221 = vmatpush.bf16.msrb.mxu2 %v3866_v30  ;;  %v3174_v30 = vor.u32 %v4452_v20, %v3173_v19  ;;  %v3750_v37 = vor.u32 %v4596_v29, %v3749_v28  ;;  %v3053_v19 = vld [vmem:[#allocation5 + $0x10] sm:$0xf]  ;;  %v4422_v20 = vld [vmem:[#allocation5 + $0x24] sm:$0xf0]  ;;  %v5116_v29 = vpop.f32.mrf.mxu1 }
  0xd9   :  { %2235 = vmatpush.bf16.msrb.mxu3 %v4058_v34  ;;  %v4446_v34 = vld [vmem:[#allocation5 + $0xe4] sm:$0xf0]  ;;  %v3437_v28 = vld [vmem:[#allocation5 + $0x310] sm:$0xf] }
  0xda   :  { %2194 = vmatpush.bf16.msrb.mxu0 %v3458_v42  ;;  %v3725_v42 = vld [vmem:[#allocation5 + $0x550] sm:$0xf]  ;;  %v3150_v44 = vor.u32 %v4446_v34, %v3149_v33  ;;  %v4566_v33 = vld [vmem:[#allocation5 + $0x4a4] sm:$0xf0]  ;;  %v3989_v34 = vld [vmem:[#allocation5 + $0x760] sm:$0xf] }
  0xdb   :  { %2208 = vmatpush.bf16.msrb.mxu1 %v3650_v45  ;;  %v3342_v45 = vor.u32 %v4494_v38, %v3341_v36  ;;  %v4656_v36 = vld [vmem:[#allocation5 + $0x774] sm:$0xf0]  ;;  %v3054_v38 = vor.u32 %v4422_v20, %v3053_v19  ;;  %v4109_v19 = vld [vmem:[#allocation5 + $0x850] sm:$0xf] }
  0xdc   :  { %2222 = vmatpush.bf16.msrb.mxu2 %v3842_v46  ;;  %v3534_v46 = vor.u32 %v4542_v41, %v3533_v40  ;;  %v4704_v40 = vld [vmem:[#allocation5 + $0x8f4] sm:$0xf0]  ;;  %v4461_v41 = vld [vmem:[#allocation5 + $0x164] sm:$0xf]  ;;  %v3990_v48 = vor.u32 %v4656_v36, %v3989_v34  ;;  %v3893_v34 = vld [vmem:[#allocation5 + $0x6a0] sm:$0xf] }
  0xdd   :  { %2236 = vmatpush.bf16.msrb.mxu3 %v4034_v50  ;;  %v3726_v50 = vor.u32 %v4590_v43, %v3725_v42  ;;  %v3223_v42 = vld [vmem:[#allocation5 + $0x178] sm:$0xf0]  ;;  %v3246_v43 = vor.u32 %v4470_v27, %v3245_v26  ;;  %v3151_v26 = vld [vmem:[#allocation5 + $0xe8] sm:$0xf0]  ;;  %v4491_v27 = vld [vmem:[#allocation5 + $0x254] sm:$0xf] }
  0xde   :  { %2195 = vmatpush.bf16.msrb.mxu0 %v3434_v58  ;;  %v3318_v58 = vor.u32 %v4488_v51, %v3317_v49  ;;  %v3965_v51 = vld [vmem:[#allocation5 + $0x730] sm:$0xf]  ;;  %v4632_v36 = vld [vmem:[#allocation5 + $0x6b4] sm:$0xf0] }
  0xdf   :  { %2209 = vmatpush.bf16.msrb.mxu1 %v3626_v62  ;;  %v3293_v62 = vld [vmem:[#allocation5 + $0x1f0] sm:$0xf] }
  0xe0   :  { %2223 = vmatpush.bf16.msrb.mxu2 %v3818_v63  ;;  %v3702_v63 = vor.u32 %v4584_v55, %v3701_v54  ;;  %v3294_v7 = vor.u32 %v4482_v0, %v3293_v62  ;;  %v4698_v55 = vld [vmem:[#allocation5 + $0x8c4] sm:$0xf0]  ;;  %v3966_v62 = vor.u32 %v4650_v52, %v3965_v51  ;;  %v3869_v51 = vld [vmem:[#allocation5 + $0x670] sm:$0xf] }
  0xe1   :  { %2237 = vmatpush.bf16.msrb.mxu3 %v4010_v2  ;;  %2196 = vmatmul.bf16.vlgmr.msrb.gmra.mxu0 %v5084_v22  ;;  %v4530_v2 = vld [vmem:[#allocation5 + $0x384] sm:$0xf0]  ;;  %v4158_v0 = vor.u32 %v4698_v55, %v4157_v53  ;;  %v4061_v53 = vld [vmem:[#allocation5 + $0x7f0] sm:$0xf] }
  0xe2   :  { %2244 = vmatpush.bf16.msra.mxu0 %v3222_v3  ;;  %2210 = vmatmul.bf16.vlgmr.msrb.gmra.mxu1 %v5086_v23  ;;  %v3677_v3 = vld [vmem:[#allocation5 + $0x4f0] sm:$0xf]  ;;  %v3486_v8 = vor.u32 %v4530_v2, %v3485_v1  ;;  %v3941_v2 = vld [vmem:[#allocation5 + $0x700] sm:$0xf]  ;;  %v4626_v52 = vld [vmem:[#allocation5 + $0x684] sm:$0xf0] }
  0xe3   :  { %2258 = vmatpush.bf16.msra.mxu1 %v3414_v4  ;;  %2224 = vmatmul.bf16.vlgmr.msrb.gmra.mxu2 %v5090_v35  ;;  %v4578_v4 = vld [vmem:[#allocation5 + $0x504] sm:$0xf0] }
  0xe4   :  { %2272 = vmatpush.bf16.msra.mxu2 %v3606_v5  ;;  %2238 = vmatmul.bf16.vlgmr.msrb.gmra.mxu3 %v5092_v39  ;;  %v3102_v5 = vor.u32 %v4434_v61, %v3101_v60  ;;  %v3678_v12 = vor.u32 %v4578_v4, %v3677_v3  ;;  %v4503_v60 = vld [vmem:[#allocation5 + $0x2b4] sm:$0xf]  ;;  %v3391_v61 = vld [vmem:[#allocation5 + $0x2c8] sm:$0xf0]  ;;  %v4644_v3 = vld [vmem:[#allocation5 + $0x714] sm:$0xf0] }
  0xe5   :  { %2286 = vmatpush.bf16.msra.mxu3 %v3798_v10  ;;  %v4428_v10 = vld [vmem:[#allocation5 + $0x54] sm:$0xf0]  ;;  %v4133_v4 = vld [vmem:[#allocation5 + $0x880] sm:$0xf]  ;;  %v3942_v14 = vor.u32 %v4644_v3, %v3941_v2  ;;  %v4674_v55 = vld [vmem:[#allocation5 + $0x804] sm:$0xf0] }
  0xe6   :  { %2245 = vmatpush.bf16.msra.mxu0 %v3198_v16  ;;  %v3653_v16 = vld [vmem:[#allocation5 + $0x4c0] sm:$0xf] }
  0xe7   :  { %2259 = vmatpush.bf16.msra.mxu1 %v3390_v17  ;;  %v4572_v17 = vld [vmem:[#allocation5 + $0x4d4] sm:$0xf0]  ;;  %v3845_v3 = vld [vmem:[#allocation5 + $0x640] sm:$0xf] }
  0xe8   :  { %2273 = vmatpush.bf16.msra.mxu2 %v3582_v18  ;;  %v3078_v18 = vor.u32 %v4428_v10, %v3077_v9  ;;  %v4449_v9 = vld [vmem:[#allocation5 + $0x104] sm:$0xf]  ;;  %v3175_v10 = vld [vmem:[#allocation5 + $0x118] sm:$0xf0] }
  0xe9   :  { %2287 = vmatpush.bf16.msra.mxu3 %v3774_v24  ;;  %v3270_v24 = vor.u32 %v4476_v13, %v3269_v11  ;;  %v5125_v11 = vpop.f32.mrf.mxu3  ;;  %v3367_v13 = vld [vmem:[#allocation5 + $0x298] sm:$0xf0] }
  0xea   :  { %2246 = vmatpush.bf16.msra.mxu0 %v3174_v30  ;;  %v3654_v30 = vor.u32 %v4572_v17, %v3653_v16  ;;  %v3178_v16 = vor.u32 %v4449_v9, %v3175_v10  ;;  %v3917_v17 = vld [vmem:[#allocation5 + $0x6d0] sm:$0xf]  ;;  %v4668_v9 = vld [vmem:[#allocation5 + $0x7d4] sm:$0xf0]  ;;  %v4425_v10 = vld [vmem:[#allocation5 + $0x44] sm:$0xf] }
  0xeb   :  { %2260 = vmatpush.bf16.msra.mxu1 %v3366_v31  ;;  %v4518_v31 = vld [vmem:[#allocation5 + $0x324] sm:$0xf0] }
  0xec   :  { %2274 = vmatpush.bf16.msra.mxu2 %v3558_v32  ;;  %v3629_v32 = vld [vmem:[#allocation5 + $0x490] sm:$0xf] }
  0xed   :  { %2288 = vmatpush.bf16.msra.mxu3 %v3750_v37  ;;  %v4181_v37 = vld [vmem:[#allocation5 + $0x8e0] sm:$0xf]  ;;  %v3630_v47 = vor.u32 %v4566_v33, %v3629_v32 }
  0xee   :  { %2247 = vmatpush.bf16.msra.mxu0 %v3150_v44  ;;  %v3438_v44 = vor.u32 %v4518_v31, %v3437_v28  ;;  %v4182_v49 = vor.u32 %v4704_v40, %v4181_v37  ;;  %v3343_v28 = vld [vmem:[#allocation5 + $0x268] sm:$0xf0]  ;;  %v4085_v37 = vld [vmem:[#allocation5 + $0x820] sm:$0xf]  ;;  %v4680_v40 = vld [vmem:[#allocation5 + $0x834] sm:$0xf0] }
  0xef   :  { %2261 = vmatpush.bf16.msra.mxu1 %v3342_v45  ;;  %v4509_v45 = vld [vmem:[#allocation5 + $0x2e4] sm:$0xf] }
  0xf0   :  { %2275 = vmatpush.bf16.msra.mxu2 %v3534_v46  ;;  %v3415_v46 = vld [vmem:[#allocation5 + $0x2f8] sm:$0xf0] }
  0xf1   :  { %2289 = vmatpush.bf16.msra.mxu3 %v3726_v50  ;;  %v3226_v50 = vor.u32 %v4461_v41, %v3223_v42  ;;  %v3418_v54 = vor.u32 %v4509_v45, %v3415_v46  ;;  %v4437_v41 = vld [vmem:[#allocation5 + $0xa4] sm:$0xf]  ;;  %v3127_v42 = vld [vmem:[#allocation5 + $0xb8] sm:$0xf0] }
  0xf2   :  { %2248 = vmatpush.bf16.msra.mxu0 %v3126_v56  ;;  %v4455_v56 = vld [vmem:[#allocation5 + $0x134] sm:$0xf]  ;;  %v3319_v45 = vld [vmem:[#allocation5 + $0x238] sm:$0xf0] }
  0xf3   :  { %2262 = vmatpush.bf16.msra.mxu1 %v3318_v58  ;;  %v3199_v58 = vld [vmem:[#allocation5 + $0x148] sm:$0xf0] }
  0xf4   :  { %2276 = vmatpush.bf16.msra.mxu2 %v3510_v59  ;;  %v5118_v59 = vpop.f32.mrf.mxu2  ;;  %v3202_v1 = vor.u32 %v4455_v56, %v3199_v58  ;;  %v4431_v56 = vld [vmem:[#allocation5 + $0x74] sm:$0xf]  ;;  %v3103_v58 = vld [vmem:[#allocation5 + $0x88] sm:$0xf0] }
  0xf5   :  { %2290 = vmatpush.bf16.msra.mxu3 %v3702_v63  ;;  %v5120_v63 = vpop.f32.mrf.mxu0  ;;  %v3106_v2 = vor.u32 %v4431_v56, %v3103_v58  ;;  %v4551_v56 = vld [vmem:[#allocation5 + $0x434] sm:$0xf]  ;;  %v3583_v58 = vld [vmem:[#allocation5 + $0x448] sm:$0xf0] }
  0xf6   :  { %2249 = vmatpush.bf16.msra.mxu0 %v3102_v5  ;;  %v5122_v5 = vpop.f32.mrf.mxu1 }
  0xf7   :  { %2263 = vmatpush.bf16.msra.mxu1 %v3294_v7  ;;  %v3394_v7 = vor.u32 %v4503_v60, %v3391_v61  ;;  %v4479_v60 = vld [vmem:[#allocation5 + $0x1f4] sm:$0xf]  ;;  %v3295_v61 = vld [vmem:[#allocation5 + $0x208] sm:$0xf0] }
  0xf8   :  { %2277 = vmatpush.bf16.msra.mxu2 %v3486_v8  ;;  %v4692_v8 = vld [vmem:[#allocation5 + $0x894] sm:$0xf0] }
  0xf9   :  { %2291 = vmatpush.bf16.msra.mxu3 %v3678_v12  ;;  %v4497_v12 = vld [vmem:[#allocation5 + $0x284] sm:$0xf]  ;;  %v4134_v15 = vor.u32 %v4692_v8, %v4133_v4  ;;  %v4620_v4 = vld [vmem:[#allocation5 + $0x654] sm:$0xf0]  ;;  %v3298_v8 = vor.u32 %v4479_v60, %v3295_v61  ;;  %v4599_v60 = vld [vmem:[#allocation5 + $0x5b4] sm:$0xf] }
  0xfa   :  { %2250 = vmatpush.bf16.msra.mxu0 %v3078_v18  ;;  %v4638_v18 = vld [vmem:[#allocation5 + $0x6e4] sm:$0xf0]  ;;  %v3370_v20 = vor.u32 %v4497_v12, %v3367_v13  ;;  %v3079_v12 = vld [vmem:[#allocation5 + $0x58] sm:$0xf0]  ;;  %v4473_v13 = vld [vmem:[#allocation5 + $0x1c4] sm:$0xf] }
  0xfb   :  { %2264 = vmatpush.bf16.msra.mxu1 %v3270_v24  ;;  %v4686_v24 = vld [vmem:[#allocation5 + $0x864] sm:$0xf0] }
  0xfc   :  { %2278 = vmatpush.bf16.msra.mxu2 %v3462_v25  ;;  %v4443_v25 = vld [vmem:[#allocation5 + $0xd4] sm:$0xf]  ;;  %v5130_v31 = vpop.f32.mrf.mxu2  ;;  %v4110_v32 = vor.u32 %v4686_v24, %v4109_v19  ;;  %v3082_v24 = vor.u32 %v4425_v10, %v3079_v12 }
  0xfd   :  { %2292 = vmatpush.bf16.msra.mxu3 %v3654_v30  ;;  %v3918_v30 = vor.u32 %v4638_v18, %v3917_v17  ;;  %v3154_v33 = vor.u32 %v4443_v25, %v3151_v26  ;;  %v4614_v17 = vld [vmem:[#allocation5 + $0x624] sm:$0xf0]  ;;  %v4013_v25 = vld [vmem:[#allocation5 + $0x790] sm:$0xf] }
  0xfe   :  { %2251 = vmatpush.bf16.msra.mxu0 %v3054_v38  ;;  %v3346_v38 = vor.u32 %v4491_v27, %v3343_v28  ;;  %v5134_v46 = vpop.f32.mrf.mxu1  ;;  %v4662_v26 = vld [vmem:[#allocation5 + $0x7a4] sm:$0xf0]  ;;  %v4419_v27 = vld [vmem:[#allocation5 + $0x14] sm:$0xf] }
  0xff   :  { %2265 = vmatpush.bf16.msra.mxu1 %v3246_v43  ;;  %v5132_v43 = vpop.f32.mrf.mxu0 }
 0x100   :  { %2279 = vmatpush.bf16.msra.mxu2 %v3438_v44  ;;  %v4485_v44 = vld [vmem:[#allocation5 + $0x224] sm:$0xf] }
 0x101   :  { %2293 = vmatpush.bf16.msra.mxu3 %v3630_v47  ;;  %2252 = vmatmul.bf16.vlgmr.msra.gmra.mxu0 %v5078_v57  ;;  %v3894_v47 = vor.u32 %v4632_v36, %v3893_v34  ;;  %v3247_v34 = vld [vmem:[#allocation5 + $0x1a8] sm:$0xf0]  ;;  %v4557_v36 = vld [vmem:[#allocation5 + $0x464] sm:$0xf] }
 0x102   :  { %2300 = vmatpush.bf16.msrb.mxu0 %v3990_v48  ;;  %2266 = vmatmul.bf16.vlgmr.msra.gmra.mxu1 %v5081_v6  ;;  %v5136_v48 = vpop.f32.mrf.mxu3 }
 0x103   :  { %2314 = vmatpush.bf16.msrb.mxu1 %v4182_v49  ;;  %2280 = vmatmul.bf16.vlgmr.msra.gmra.mxu2 %v5084_v22  ;;  %v4086_v49 = vor.u32 %v4680_v40, %v4085_v37  ;;  %v3607_v37 = vld [vmem:[#allocation5 + $0x478] sm:$0xf0] }
 0x104   :  { %2328 = vmatpush.bf16.msrb.mxu2 %v3226_v50  ;;  %2294 = vmatmul.bf16.vlgmr.msra.gmra.mxu3 %v5086_v23  ;;  %v3130_v50 = vor.u32 %v4437_v41, %v3127_v42  ;;  %v3799_v41 = vld [vmem:[#allocation5 + $0x5f8] sm:$0xf0]  ;;  %v4653_v42 = vld [vmem:[#allocation5 + $0x764] sm:$0xf] }
 0x105   :  { %2342 = vmatpush.bf16.msrb.mxu3 %v3418_v54  ;;  %v3322_v54 = vor.u32 %v4485_v44, %v3319_v45  ;;  %v3991_v44 = vld [vmem:[#allocation5 + $0x778] sm:$0xf0]  ;;  %v4014_v45 = vor.u32 %v4662_v26, %v4013_v25  ;;  %v4689_v26 = vld [vmem:[#allocation5 + $0x884] sm:$0xf] }
 0x106   :  { %2301 = vmatpush.bf16.msrb.mxu0 %v3966_v62  ;;  %v3870_v62 = vor.u32 %v4626_v52, %v3869_v51  ;;  %v5144_v28 = vpop.f32.mrf.mxu1  ;;  %v3610_v52 = vor.u32 %v4557_v36, %v3607_v37  ;;  %v3943_v25 = vld [vmem:[#allocation5 + $0x718] sm:$0xf0]  ;;  %v3535_v36 = vld [vmem:[#allocation5 + $0x3e8] sm:$0xf0]  ;;  %v4587_v37 = vld [vmem:[#allocation5 + $0x554] sm:$0xf] }
 0x107   :  { %2315 = vmatpush.bf16.msrb.mxu1 %v4158_v0  ;;  %v5138_v0 = vpop.f32.mrf.mxu2  ;;  %v5140_v18 = vpop.f32.mrf.mxu0 }
 0x108   :  { %2329 = vmatpush.bf16.msrb.mxu2 %v3202_v1  ;;  %v4062_v1 = vor.u32 %v4674_v55, %v4061_v53  ;;  %v3994_v55 = vor.u32 %v4653_v42, %v3991_v44  ;;  %v3919_v42 = vld [vmem:[#allocation5 + $0x6e8] sm:$0xf0] }
 0x109   :  { %2343 = vmatpush.bf16.msrb.mxu3 %v3394_v7  ;;  %v4037_v7 = vld [vmem:[#allocation5 + $0x7c0] sm:$0xf] }
 0x10a   :  { %2302 = vmatpush.bf16.msrb.mxu0 %v3942_v14  ;;  %v3271_v14 = vld [vmem:[#allocation5 + $0x1d8] sm:$0xf0]  ;;  %v5142_v19 = vpop.f32.mrf.mxu3 }
 0x10b   :  { %2316 = vmatpush.bf16.msrb.mxu1 %v4134_v15  ;;  %v3846_v15 = vor.u32 %v4620_v4, %v3845_v3  ;;  %v4695_v4 = vld [vmem:[#allocation5 + $0x8b4] sm:$0xf] }
 0x10c   :  { %2330 = vmatpush.bf16.msrb.mxu2 %v3178_v16  ;;  %v3821_v16 = vld [vmem:[#allocation5 + $0x610] sm:$0xf] }
 0x10d   :  { %2344 = vmatpush.bf16.msrb.mxu3 %v3370_v20  ;;  %v4038_v20 = vor.u32 %v4668_v9, %v4037_v7  ;;  %v3822_v40 = vor.u32 %v4614_v17, %v3821_v16  ;;  %v4159_v7 = vld [vmem:[#allocation5 + $0x8c8] sm:$0xf0]  ;;  %v3586_v9 = vor.u32 %v4551_v56, %v3583_v58  ;;  %v4593_v16 = vld [vmem:[#allocation5 + $0x584] sm:$0xf]  ;;  %v3703_v58 = vld [vmem:[#allocation5 + $0x538] sm:$0xf0] }
 0x10e   :  { %2303 = vmatpush.bf16.msrb.mxu0 %v3918_v30  ;;  %v3274_v30 = vor.u32 %v4473_v13, %v3271_v14  ;;  %v4545_v14 = vld [vmem:[#allocation5 + $0x404] sm:$0xf]  ;;  %v4162_v17 = vor.u32 %v4695_v4, %v4159_v7 }
 0x10f   :  { %2317 = vmatpush.bf16.msrb.mxu1 %v4110_v32  ;;  %v3055_v32 = vld [vmem:[#allocation5 + $0x28] sm:$0xf0]  ;;  %v5146_v53 = vpop.f32.mrf.mxu2  ;;  %v5148_v3 = vpop.f32.mrf.mxu0 }
 0x110   :  { %2331 = vmatpush.bf16.msrb.mxu2 %v3154_v33  ;;  %v4467_v33 = vld [vmem:[#allocation5 + $0x194] sm:$0xf] }
 0x111   :  { %2345 = vmatpush.bf16.msrb.mxu3 %v3346_v38  ;;  %v4605_v38 = vld [vmem:[#allocation5 + $0x5e4] sm:$0xf]  ;;  %v3250_v51 = vor.u32 %v4467_v33, %v3247_v34  ;;  %v4539_v34 = vld [vmem:[#allocation5 + $0x3d4] sm:$0xf] }
 0x112   :  { %2304 = vmatpush.bf16.msrb.mxu0 %v3894_v47  ;;  %v3058_v47 = vor.u32 %v4419_v27, %v3055_v32  ;;  %v5152_v10 = vpop.f32.mrf.mxu3  ;;  %v4135_v27 = vld [vmem:[#allocation5 + $0x898] sm:$0xf0] }
 0x113   :  { %2318 = vmatpush.bf16.msrb.mxu1 %v4086_v49  ;;  %v4701_v49 = vld [vmem:[#allocation5 + $0x8e4] sm:$0xf] }
 0x114   :  { %2332 = vmatpush.bf16.msrb.mxu2 %v3130_v50  ;;  %v4183_v50 = vld [vmem:[#allocation5 + $0x8f8] sm:$0xf0] }
 0x115   :  { %2346 = vmatpush.bf16.msrb.mxu3 %v3322_v54  ;;  %v3802_v54 = vor.u32 %v4605_v38, %v3799_v41  ;;  %v4186_v61 = vor.u32 %v4701_v49, %v4183_v50  ;;  %v4138_v38 = vor.u32 %v4689_v26, %v4135_v27  ;;  %v4635_v41 = vld [vmem:[#allocation5 + $0x6d4] sm:$0xf]  ;;  %v5166_v26 = vld [vmem:[#allocation7] sm:$0x3f] }
 0x116   :  { %2305 = vmatpush.bf16.msrb.mxu0 %v3870_v62  ;;  %v3775_v62 = vld [vmem:[#allocation5 + $0x5c8] sm:$0xf0]  ;;  %v3922_v50 = vor.u32 %v4635_v41, %v3919_v42  ;;  %v3655_v41 = vld [vmem:[#allocation5 + $0x4d8] sm:$0xf0]  ;;  %v4617_v42 = vld [vmem:[#allocation5 + $0x644] sm:$0xf] }
 0x117   :  { %2319 = vmatpush.bf16.msrb.mxu1 %v4062_v1  ;;  %v4647_v1 = vld [vmem:[#allocation5 + $0x734] sm:$0xf]  ;;  %v3778_v12 = vor.u32 %v4599_v60, %v3775_v62  ;;  %v5158_v44 = vpop.f32.mrf.mxu2  ;;  %v5160_v49 = vpop.f32.mrf.mxu0  ;;  %v4629_v60 = vld [vmem:[#allocation5 + $0x6a4] sm:$0xf] }
 0x118   :  { %2333 = vmatpush.bf16.msrb.mxu2 %v3106_v2  ;;  %v3967_v2 = vld [vmem:[#allocation5 + $0x748] sm:$0xf0] }
 0x119   :  { %2347 = vmatpush.bf16.msrb.mxu3 %v3298_v8  ;;  %v5150_v8 = vpop.f32.mrf.mxu1  ;;  %v3970_v13 = vor.u32 %v4647_v1, %v3967_v2  ;;  %v4677_v1 = vld [vmem:[#allocation5 + $0x824] sm:$0xf]  ;;  %v4087_v2 = vld [vmem:[#allocation5 + $0x838] sm:$0xf0] }
 0x11a   :  { %2306 = vmatpush.bf16.msrb.mxu0 %v3846_v15  ;;  %v3559_v15 = vld [vmem:[#allocation5 + $0x418] sm:$0xf0]  ;;  %v5164_v62 = vpop.f32.mrf.mxu3 }
 0x11b   :  { %2320 = vmatpush.bf16.msrb.mxu1 %v4038_v20  ;;  %v3751_v20 = vld [vmem:[#allocation5 + $0x598] sm:$0xf0] }
 0x11c   :  { %2334 = vmatpush.bf16.msrb.mxu2 %v3082_v24  ;;  %v4641_v24 = vld [vmem:[#allocation5 + $0x704] sm:$0xf]  ;;  %v3754_v32 = vor.u32 %v4593_v16, %v3751_v20  ;;  %v3679_v16 = vld [vmem:[#allocation5 + $0x508] sm:$0xf0] }
 0x11d   :  { %2348 = vmatpush.bf16.msrb.mxu3 %v3274_v30  ;;  %v3562_v30 = vor.u32 %v4545_v14, %v3559_v15  ;;  %v3946_v33 = vor.u32 %v4641_v24, %v3943_v25  ;;  %v4575_v14 = vld [vmem:[#allocation5 + $0x4f4] sm:$0xf]  ;;  %v4090_v15 = vor.u32 %v4677_v1, %v4087_v2  ;;  %v3871_v20 = vld [vmem:[#allocation5 + $0x688] sm:$0xf0] }
 0x11e   :  { %2307 = vmatpush.bf16.msrb.mxu0 %v3822_v40  ;;  %v3727_v40 = vld [vmem:[#allocation5 + $0x568] sm:$0xf0]  ;;  %v4671_v24 = vld [vmem:[#allocation5 + $0x7f4] sm:$0xf] }
 0x11f   :  { %2321 = vmatpush.bf16.msrb.mxu1 %v4014_v45  ;;  %v4111_v45 = vld [vmem:[#allocation5 + $0x868] sm:$0xf0]  ;;  %v4563_v1 = vld [vmem:[#allocation5 + $0x494] sm:$0xf] }
 0x120   :  { %2335 = vmatpush.bf16.msrb.mxu2 %v3058_v47  ;;  %v3538_v47 = vor.u32 %v4539_v34, %v3535_v36  ;;  %v4063_v25 = vld [vmem:[#allocation5 + $0x808] sm:$0xf0]  ;;  %v2085_v34 = vpop.f32.mrf.mxu0  ;;  %v4521_v36 = vld [vmem:[#allocation5 + $0x344] sm:$0xf] }
 0x121   :  { %2349 = vmatpush.bf16.msrb.mxu3 %v3250_v51  ;;  %2308 = vmatmul.bf16.vlgmr.msrb.gmra.mxu0 %v5090_v35  ;;  %v4533_v51 = vld [vmem:[#allocation5 + $0x3a4] sm:$0xf] }
 0x122   :  { %2356 = vmatpush.bf16.msra.mxu0 %v3610_v52  ;;  %2322 = vmatmul.bf16.vlgmr.msrb.gmra.mxu1 %v5092_v39  ;;  %v3511_v52 = vld [vmem:[#allocation5 + $0x3b8] sm:$0xf0] }
 0x123   :  { %2370 = vmatpush.bf16.msra.mxu1 %v3802_v54  ;;  %2336 = vmatmul.bf16.vlgmr.msrb.gmra.mxu2 %v5078_v57  ;;  %v4683_v57 = vld [vmem:[#allocation5 + $0x854] sm:$0xf]  ;;  %v4581_v54 = vld [vmem:[#allocation5 + $0x524] sm:$0xf]  ;;  %v3514_v4 = vor.u32 %v4533_v51, %v3511_v52  ;;  %v428_v51 = vperm.slane %v5166_v26, 2 }
 0x124   :  { %2384 = vmatpush.bf16.msra.mxu2 %v3994_v55  ;;  %2350 = vmatmul.bf16.vlgmr.msrb.gmra.mxu3 %v5081_v6  ;;  %v3730_v6 = vor.u32 %v4587_v37, %v3727_v40  ;;  %v5162_v55 = vpop.f32.mrf.mxu1  ;;  %v4114_v56 = vor.u32 %v4683_v57, %v4111_v45  ;;  %v3706_v7 = vor.u32 %v4581_v54, %v3703_v58  ;;  %v3463_v37 = vld [vmem:[#allocation5 + $0x358] sm:$0xf0]  ;;  %v5172_v54 = vpop.f32.mrf.mxu3 }
 0x125   :  { %2398 = vmatpush.bf16.msra.mxu3 %v4186_v61  ;;  %v3895_v61 = vld [vmem:[#allocation5 + $0x6b8] sm:$0xf0]  ;;  %v4066_v40 = vor.u32 %v4671_v24, %v4063_v25  ;;  %v3466_v52 = vor.u32 %v4521_v36, %v3463_v37 }
 0x126   :  { %2357 = vmatpush.bf16.msra.mxu0 %v3586_v9  ;;  %v3898_v9 = vor.u32 %v4629_v60, %v3895_v61  ;;  %v3847_v57 = vld [vmem:[#allocation5 + $0x658] sm:$0xf0]  ;;  %v4515_v60 = vld [vmem:[#allocation5 + $0x314] sm:$0xf]  ;;  %v3439_v61 = vld [vmem:[#allocation5 + $0x328] sm:$0xf0] }
 0x127   :  { %2371 = vmatpush.bf16.msra.mxu1 %v3778_v12  ;;  %v4527_v12 = vld [vmem:[#allocation5 + $0x374] sm:$0xf]  ;;  %v3850_v58 = vor.u32 %v4617_v42, %v3847_v57  ;;  %v4720_v37 = vld [vmem:[#allocation8 + $0x78] sm:$0xff] }
 0x128   :  { %2385 = vmatpush.bf16.msra.mxu2 %v3970_v13  ;;  %v3487_v13 = vld [vmem:[#allocation5 + $0x388] sm:$0xf0]  ;;  %v4728_v42 = vld [vmem:[#allocation8 + $0xb8] sm:$0xff] }
 0x129   :  { %2399 = vmatpush.bf16.msra.mxu3 %v4162_v17  ;;  %v4623_v17 = vld [vmem:[#allocation5 + $0x674] sm:$0xf]  ;;  %v3490_v27 = vor.u32 %v4527_v12, %v3487_v13  ;;  %v427_v13 = vperm.slane %v5166_v26, 1 }
 0x12a   :  { %2358 = vmatpush.bf16.msra.mxu0 %v3562_v30  ;;  %v5168_v30 = vpop.f32.mrf.mxu2 }
 0x12b   :  { %2372 = vmatpush.bf16.msra.mxu1 %v3754_v32  ;;  %v3682_v32 = vor.u32 %v4575_v14, %v3679_v16  ;;  %v4659_v14 = vld [vmem:[#allocation5 + $0x794] sm:$0xf] }
 0x12c   :  { %2386 = vmatpush.bf16.msra.mxu2 %v3946_v33  ;;  %v3874_v33 = vor.u32 %v4623_v17, %v3871_v20  ;;  %v2099_v45 = vpop.f32.mrf.mxu1  ;;  %v3442_v17 = vor.u32 %v4515_v60, %v3439_v61  ;;  %v2127_v57 = vpop.f32.mrf.mxu3 }
 0x12d   :  { %2400 = vmatpush.bf16.msra.mxu3 %v4138_v38  ;;  %v4569_v38 = vld [vmem:[#allocation5 + $0x4c4] sm:$0xf] }
 0x12e   :  { %2359 = vmatpush.bf16.msra.mxu0 %v3538_v47  ;;  %v426_v47 = vperm.slane %v5166_v26, 0 }
 0x12f   :  { %2373 = vmatpush.bf16.msra.mxu1 %v3730_v6  ;;  %v4665_v6 = vld [vmem:[#allocation5 + $0x7c4] sm:$0xf] }
 0x130   :  { %2387 = vmatpush.bf16.msra.mxu2 %v3922_v50  ;;  %v4039_v50 = vld [vmem:[#allocation5 + $0x7d8] sm:$0xf0]  ;;  %v1918_v12 = vadd.f32 %v5114_v21, %v426_v47  ;;  %v1920_v16 = vadd.f32 %v5120_v63, %v426_v47  ;;  %v2004_v21 = vadd.f32 %v5146_v53, %v427_v13 }
 0x131   :  { %2401 = vmatpush.bf16.msra.mxu3 %v4114_v56  ;;  %v3658_v56 = vor.u32 %v4569_v38, %v3655_v41  ;;  %v4042_v2 = vor.u32 %v4665_v6, %v4039_v50  ;;  %v2087_v38 = vpop.f32.mrf.mxu0  ;;  %v2002_v41 = vadd.f32 %v5138_v0, %v427_v13  ;;  %v4711_v6 = vld [vmem:[#allocation8 + $0x30] sm:$0xff]  ;;  %v4736_v0 = vld [vmem:[#allocation8 + $0xf8] sm:$0xff] }
 0x132   :  { %2360 = vmatpush.bf16.msra.mxu0 %v3514_v4  ;;  %v3631_v4 = vld [vmem:[#allocation5 + $0x4a8] sm:$0xf0]  ;;  %v2113_v25 = vpop.f32.mrf.mxu2  ;;  %v1932_v36 = vadd.f32 %v5116_v29, %v1918_v12  ;;  %v2088_v47 = vadd.f32 %v2087_v38, %v428_v51  ;;  %v2018_v53 = vadd.f32 %v5152_v10, %v2004_v21 }
 0x133   :  { %2374 = vmatpush.bf16.msra.mxu1 %v3706_v7  ;;  %v4611_v7 = vld [vmem:[#allocation5 + $0x614] sm:$0xf]  ;;  %v3634_v20 = vor.u32 %v4563_v1, %v3631_v4  ;;  %v4709_v1 = vld [vmem:[#allocation8 + $0x20] sm:$0xff] }
 0x134   :  { %2388 = vmatpush.bf16.msra.mxu2 %v3898_v9  ;;  %v3823_v9 = vld [vmem:[#allocation5 + $0x628] sm:$0xf0]  ;;  %v2101_v63 = vpop.f32.mrf.mxu1  ;;  %v1946_v29 = vadd.f32 %v5118_v59, %v1932_v36 }
 0x135   :  { %2402 = vmatpush.bf16.msra.mxu3 %v4090_v15  ;;  %v4015_v15 = vld [vmem:[#allocation5 + $0x7a8] sm:$0xf0]  ;;  %v3826_v24 = vor.u32 %v4611_v7, %v3823_v9  ;;  %v2102_v59 = vadd.f32 %v2101_v63, %v2088_v47 }
 0x136   :  { %2361 = vmatpush.bf16.msra.mxu0 %v3490_v27  ;;  %v2086_v27 = vadd.f32 %v2085_v34, %v428_v51  ;;  %v4727_v51 = vld [vmem:[#allocation8 + $0xb0] sm:$0xff]  ;;  %v4717_v9 = vld [vmem:[#allocation8 + $0x60] sm:$0xff]  ;;  %v4714_v38 = vld [vmem:[#allocation8 + $0x48] sm:$0xff] }
 0x137   :  { %2375 = vmatpush.bf16.msra.mxu1 %v3682_v32  ;;  %v4018_v32 = vor.u32 %v4659_v14, %v4015_v15  ;;  %v4725_v14 = vld [vmem:[#allocation8 + $0xa0] sm:$0xff]  ;;  %v4722_v63 = vld [vmem:[#allocation8 + $0x88] sm:$0xff] }
 0x138   :  { %2389 = vmatpush.bf16.msra.mxu2 %v3874_v33  ;;  %v4712_v33 = vld [vmem:[#allocation8 + $0x38] sm:$0xff]  ;;  %v2100_v34 = vadd.f32 %v2099_v45, %v2086_v27  ;;  %v2016_v45 = vadd.f32 %v5142_v19, %v2002_v41  ;;  %v4733_v36 = vld [vmem:[#allocation8 + $0xe0] sm:$0xff] }
 0x139   :  { %2403 = vmatpush.bf16.msra.mxu3 %v4066_v40  ;;  %v1934_v40 = vadd.f32 %v5122_v5, %v1920_v16  ;;  %v4719_v5 = vld [vmem:[#allocation8 + $0x70] sm:$0xff]  ;;  %v4708_v16 = vld [vmem:[#allocation8 + $0x18] sm:$0xff]  ;;  %v4713_v47 = vld [vmem:[#allocation8 + $0x40] sm:$0xff] }
 0x13a   :  { %2362 = vmatpush.bf16.msra.mxu0 %v3466_v52  ;;  %v2114_v10 = vadd.f32 %v2113_v25, %v2100_v34  ;;  %v4710_v52 = vld [vmem:[#allocation8 + $0x28] sm:$0xff]  ;;  %v2030_v19 = vadd.f32 %v5148_v3, %v2016_v45  ;;  %v4731_v34 = vld [vmem:[#allocation8 + $0xd0] sm:$0xff] }
 0x13b   :  { %2376 = vmatpush.bf16.msra.mxu1 %v3658_v56  ;;  %v1948_v50 = vadd.f32 %v5130_v31, %v1934_v40  ;;  %v2032_v31 = vadd.f32 %v5160_v49, %v2018_v53  ;;  %v2115_v56 = vpop.f32.mrf.mxu2  ;;  %v4730_v53 = vld [vmem:[#allocation8 + $0xc8] sm:$0xff] }
 0x13c   :  { %2390 = vmatpush.bf16.msra.mxu2 %v3850_v58  ;;  %v4735_v58 = vld [vmem:[#allocation8 + $0xf0] sm:$0xff]  ;;  %v2128_v61 = vadd.f32 %v2127_v57, %v2114_v10  ;;  %v2116_v4 = vadd.f32 %v2115_v56, %v2102_v59  ;;  %v2044_v3 = vadd.f32 %v5150_v8, %v2030_v19  ;;  %v4724_v8 = vld [vmem:[#allocation8 + $0x98] sm:$0xff] }
 0x13d   :  { %2404 = vmatpush.bf16.msra.mxu3 %v4042_v2  ;;  %v2046_v7 = vadd.f32 %v5162_v55, %v2032_v31  ;;  %v4716_v55 = vld [vmem:[#allocation8 + $0x58] sm:$0xff] }
 0x13e   :  { %2363 = vmatpush.bf16.msra.mxu0 %v3442_v17  ;;  %v2141_v60 = vpop.f32.mrf.mxu0  ;;  %v4744_v19 = vld [vmem:[#allocation8 + $0x138] sm:$0xff] }
 0x13f   :  { %2377 = vmatpush.bf16.msra.mxu1 %v3634_v20  ;;  %v2155_v2 = vpop.f32.mrf.mxu1  ;;  %v2060_v13 = vadd.f32 %v5168_v30, %v2046_v7  ;;  %v2142_v15 = vadd.f32 %v2141_v60, %v2128_v61 }
 0x140   :  { %2391 = vmatpush.bf16.msra.mxu2 %v3826_v24  ;;  %v2058_v24 = vadd.f32 %v5158_v44, %v2044_v3 }
 0x141   :  { %2405 = vmatpush.bf16.msra.mxu3 %v4018_v32  ;;  %2364 = vmatmul.bf16.vlgmr.msra.gmra.mxu0 %v5084_v22  ;;  %v1960_v22 = vadd.f32 %v5125_v11, %v1946_v29  ;;  %v4734_v11 = vld [vmem:[#allocation8 + $0xe8] sm:$0xff]  ;;  %v2156_v25 = vadd.f32 %v2155_v2, %v2142_v15  ;;  %v4707_v32 = vld [vmem:[#allocation8 + $0x10] sm:$0xff] }
 0x142   :  { %2818 = vmatpush.bf16.msrb.mxu0 %v4712_v33  ;;  %2378 = vmatmul.bf16.vlgmr.msra.gmra.mxu1 %v5086_v23  ;;  %v4718_v23 = vld [vmem:[#allocation8 + $0x68] sm:$0xff]  ;;  %v2072_v44 = vadd.f32 %v5164_v62, %v2058_v24  ;;  %v4741_v24 = vld [vmem:[#allocation8 + $0x120] sm:$0xff] }
 0x143   :  { %2832 = vmatpush.bf16.msrb.mxu1 %v4720_v37  ;;  %2392 = vmatmul.bf16.vlgmr.msra.gmra.mxu2 %v5090_v35  ;;  %v1962_v35 = vadd.f32 %v5136_v48, %v1948_v50  ;;  %v1974_v49 = vadd.f32 %v5132_v43, %v1960_v22  ;;  %v2129_v48 = vpop.f32.mrf.mxu3  ;;  %v4706_v37 = vld [vmem:[#allocation8 + $0x8] sm:$0xff]  ;;  %v4721_v50 = vld [vmem:[#allocation8 + $0x80] sm:$0xff] }
 0x144   :  { %2406 = vmatmul.bf16.vlgmr.msra.gmra.mxu3 %v5092_v39  ;;  %2846 = vmatpush.bf16.msrb.mxu2 %v4728_v42  ;;  %v4726_v39 = vld [vmem:[#allocation8 + $0xa8] sm:$0xff]  ;;  %v2130_v17 = vadd.f32 %v2129_v48, %v2116_v4  ;;  %v4705_v42 = vld [vmem:[#allocation8] sm:$0xff] }
 0x145   :  { %2860 = vmatpush.bf16.msrb.mxu3 %v4736_v0  ;;  %v1976_v12 = vadd.f32 %v5140_v18, %v1962_v35  ;;  %v1988_v43 = vadd.f32 %v5134_v46, %v1974_v49  ;;  %v2074_v18 = vadd.f32 %v5172_v54, %v2060_v13  ;;  %v4715_v46 = vld [vmem:[#allocation8 + $0x50] sm:$0xff]  ;;  %v429_v0 = vperm.slane %v5166_v26, 3 }
 0x146   :  { %2819 = vmatpush.bf16.msrb.mxu0 %v4711_v6  ;;  %v2143_v30 = vpop.f32.mrf.mxu0  ;;  %v4723_v54 = vld [vmem:[#allocation8 + $0x90] sm:$0xff]  ;;  %v2169_v57 = vpop.f32.mrf.mxu2 }
 0x147   :  { %2833 = vmatpush.bf16.msrb.mxu1 %v4719_v5  ;;  %v1990_v20 = vadd.f32 %v5144_v28, %v1976_v12  ;;  %v2144_v27 = vadd.f32 %v2143_v30, %v2130_v17  ;;  %v2157_v33 = vpop.f32.mrf.mxu1  ;;  %4777 = vtanh.f32 %v1988_v43  ;;  %v4732_v28 = vld [vmem:[#allocation8 + $0xd8] sm:$0xff]  ;;  %v2170_v22 = vadd.f32 %v2169_v57, %v429_v0  ;;  %v4743_v49 = vld [vmem:[#allocation8 + $0x130] sm:$0xff]  ;;  %v4742_v12 = vld [vmem:[#allocation8 + $0x128] sm:$0xff] }
 0x148   :  { %2847 = vmatpush.bf16.msrb.mxu2 %v4727_v51 }
 0x149   :  { %2861 = vmatpush.bf16.msrb.mxu3 %v4735_v58  ;;  %4779 = vtanh.f32 %v1990_v20  ;;  %v2158_v21 = vadd.f32 %v2157_v33, %v2144_v27  ;;  %v4738_v27 = vld [vmem:[#allocation8 + $0x108] sm:$0xff]  ;;  %v4737_v33 = vld [vmem:[#allocation8 + $0x100] sm:$0xff] }
 0x14a   :  { %2820 = vmatpush.bf16.msrb.mxu0 %v4710_v52  ;;  %4781 = vtanh.f32 %v2074_v18  ;;  %v4729_v52 = vld [vmem:[#allocation8 + $0xc0] sm:$0xff]  ;;  %v4740_v18 = vld [vmem:[#allocation8 + $0x118] sm:$0xff] }
 0x14b   :  { %2834 = vmatpush.bf16.msrb.mxu1 %v4718_v23  ;;  %4783 = vtanh.f32 %v2156_v25  ;;  %v2183_v6 = vpop.f32.mrf.mxu3 }
 0x14c   :  { %2848 = vmatpush.bf16.msrb.mxu2 %v4726_v39  ;;  %4785 = vtanh.f32 %v2158_v21  ;;  %v2184_v56 = vadd.f32 %v2183_v6, %v2170_v22  ;;  %v4747_v22 = vld [vmem:[#allocation8 + $0x150] sm:$0xff] }
 0x14d   :  { %2862 = vmatpush.bf16.msrb.mxu3 %v4734_v11  ;;  %v4778_v40 = vpop.eup %4777  ;;  %4787 = vtanh.f32 %v2072_v44 }
 0x14e   :  { %2821 = vmatpush.bf16.msrb.mxu0 %v4709_v1  ;;  %v2171_v31 = vpop.f32.mrf.mxu2 }
 0x14f   :  { %2835 = vmatpush.bf16.msrb.mxu1 %v4717_v9  ;;  %v4780_v41 = vpop.eup %4779  ;;  %v2172_v39 = vadd.f32 %v2171_v31, %v429_v0 }
 0x150   :  { %2849 = vmatpush.bf16.msrb.mxu2 %v4725_v14  ;;  %v4782_v62 = vpop.eup %4781  ;;  %v2424_v51 = vpack.c.bf16 %v4780_v41, %v4778_v40 }
 0x151   :  { %2863 = vmatpush.bf16.msrb.mxu3 %v4733_v36  ;;  %v4784_v29 = vpop.eup %4783 }
 0x152   :  { %2822 = vmatpush.bf16.msrb.mxu0 %v4708_v16  ;;  %v4786_v5 = vpop.eup %4785 }
 0x153   :  { %2836 = vmatpush.bf16.msrb.mxu1 %v4716_v55  ;;  %v4788_v45 = vpop.eup %4787  ;;  %v2426_v10 = vpack.c.bf16 %v4786_v5, %v4784_v29  ;;  %v2185_v23 = vpop.f32.mrf.mxu3 }
 0x154   :  { %2850 = vmatpush.bf16.msrb.mxu2 %v4724_v8  ;;  %v2425_v59 = vpack.c.bf16 %v4782_v62, %v4788_v45  ;;  %v2186_v61 = vadd.f32 %v2185_v23, %v2172_v39  ;;  %v4739_v8 = vld [vmem:[#allocation8 + $0x110] sm:$0xff]  ;;  %v4750_v62 = vld [vmem:[#allocation8 + $0x168] sm:$0xff]  ;;  %v4745_v39 = vld [vmem:[#allocation8 + $0x140] sm:$0xff] }
 0x155   :  { %2864 = vmatpush.bf16.msrb.mxu3 %v4732_v28  ;;  %v4752_v28 = vld [vmem:[#allocation8 + $0x178] sm:$0xff]  ;;  %v4746_v23 = vld [vmem:[#allocation8 + $0x148] sm:$0xff] }
 0x156   :  { %2823 = vmatpush.bf16.msrb.mxu0 %v4707_v32  ;;  %v430_v32 = vperm.slane %v5166_v26, 4 }
 0x157   :  { %2837 = vmatpush.bf16.msrb.mxu1 %v4715_v46 }
 0x158   :  { %2851 = vmatpush.bf16.msrb.mxu2 %v4723_v54 }
 0x159   :  { %2865 = vmatpush.bf16.msrb.mxu3 %v4731_v34 }
 0x15a   :  { %2824 = vmatpush.bf16.msrb.mxu0 %v4706_v37 }
 0x15b   :  { %2838 = vmatpush.bf16.msrb.mxu1 %v4714_v38 }
 0x15c   :  { %2852 = vmatpush.bf16.msrb.mxu2 %v4722_v63 }
 0x15d   :  { %2866 = vmatpush.bf16.msrb.mxu3 %v4730_v53 }
 0x15e   :  { %2825 = vmatpush.bf16.msrb.mxu0 %v4705_v42  ;;  %v2197_v35 = vpop.f32.mrf.mxu0  ;;  %v4751_v42 = vld [vmem:[#allocation8 + $0x170] sm:$0xff] }
 0x15f   :  { %2839 = vmatpush.bf16.msrb.mxu1 %v4713_v47  ;;  %v2211_v58 = vpop.f32.mrf.mxu1  ;;  %v2198_v60 = vadd.f32 %v2197_v35, %v2184_v56 }
 0x160   :  { %2853 = vmatpush.bf16.msrb.mxu2 %v4721_v50  ;;  %v4749_v50 = vld [vmem:[#allocation8 + $0x160] sm:$0xff] }
 0x161   :  { %2826 = vmatmul.bf16.vlgmr.msrb.gmra.mxu0 %v2424_v51  ;;  %2867 = vmatpush.bf16.msrb.mxu3 %v4729_v52  ;;  %v2212_v1 = vadd.f32 %v2211_v58, %v2198_v60  ;;  %v431_v60 = vperm.slane %v5166_v26, 5 }
 0x162   :  { %2840 = vmatmul.bf16.vlgmr.msrb.gmra.mxu1 %v2425_v59  ;;  %2874 = vmatpush.bf16.msra.mxu0 %v4744_v19 }
 0x163   :  { %2854 = vmatmul.bf16.vlgmr.msrb.gmra.mxu2 %v2426_v10  ;;  %2888 = vmatpush.bf16.msra.mxu1 %v4752_v28  ;;  %v4748_v10 = vld [vmem:[#allocation8 + $0x158] sm:$0xff]  ;;  %v4754_v28 = vld [vmem:[#allocation11 + $0x8] sm:$0xff] }
 0x166   :  { %v2225_v2 = vpop.f32.mrf.mxu2  ;;  %v2199_v4 = vpop.f32.mrf.mxu0  ;;  %2875 = vmatpush.bf16.msra.mxu0 %v4743_v49 }
 0x167   :  { %v2239_v11 = vpop.f32.mrf.mxu3  ;;  %v2200_v7 = vadd.f32 %v2199_v4, %v2186_v61  ;;  %v2226_v9 = vadd.f32 %v2225_v2, %v2212_v1  ;;  %v2213_v48 = vpop.f32.mrf.mxu1  ;;  %2889 = vmatpush.bf16.msra.mxu1 %v4751_v42 }
 0x169   :  { %v2214_v3 = vadd.f32 %v2213_v48, %v2200_v7  ;;  %v2240_v13 = vadd.f32 %v2239_v11, %v2226_v9 }
 0x16a   :  { %2876 = vmatpush.bf16.msra.mxu0 %v4742_v12 }
 0x16b   :  { %4789 = vtanh.f32 %v2240_v13  ;;  %2890 = vmatpush.bf16.msra.mxu1 %v4750_v62 }
 0x16e   :  { %v2227_v14 = vpop.f32.mrf.mxu2  ;;  %2877 = vmatpush.bf16.msra.mxu0 %v4741_v24 }
 0x16f   :  { %v2228_v15 = vadd.f32 %v2227_v14, %v2214_v3  ;;  %v2241_v16 = vpop.f32.mrf.mxu3  ;;  %2891 = vmatpush.bf16.msra.mxu1 %v4749_v50 }
 0x171   :  { %v2242_v17 = vadd.f32 %v2241_v16, %v2228_v15  ;;  %v4790_v43 = vpop.eup %4789 }
 0x172   :  { %2878 = vmatpush.bf16.msra.mxu0 %v4740_v18 }
 0x173   :  { %4791 = vtanh.f32 %v2242_v17  ;;  %2892 = vmatpush.bf16.msra.mxu1 %v4748_v10 }
 0x176   :  { %2879 = vmatpush.bf16.msra.mxu0 %v4739_v8 }
 0x177   :  { %2893 = vmatpush.bf16.msra.mxu1 %v4747_v22 }
 0x179   :  { %v4792_v55 = vpop.eup %4791 }
 0x17a   :  { %v2427_v20 = vpack.c.bf16 %v4792_v55, %v4790_v43  ;;  %2880 = vmatpush.bf16.msra.mxu0 %v4738_v27  ;;  %v4760_v27 = vld [vmem:[#allocation11 + $0x38] sm:$0xff] }
 0x17b   :  { %2894 = vmatpush.bf16.msra.mxu1 %v4746_v23  ;;  %2973 = vmatpush.bf16.msra.mxu2 %v4760_v27 }
 0x17c   :  { %2868 = vmatmul.bf16.vlgmr.msrb.gmra.mxu3 %v2427_v20 }
 0x17e   :  { %v2253_v30 = vpop.f32.mrf.mxu0  ;;  %2881 = vmatpush.bf16.msra.mxu0 %v4737_v33  ;;  %v4758_v33 = vld [vmem:[#allocation11 + $0x28] sm:$0xff] }
 0x17f   :  { %v2267_v25 = vpop.f32.mrf.mxu1  ;;  %v2254_v36 = vadd.f32 %v2253_v30, %v430_v32  ;;  %2895 = vmatpush.bf16.msra.mxu1 %v4745_v39 }
 0x181   :  { %v2268_v44 = vadd.f32 %v2267_v25, %v2254_v36  ;;  %v4757_v36 = vld [vmem:[#allocation11 + $0x20] sm:$0xff] }
 0x186   :  { %v2281_v46 = vpop.f32.mrf.mxu2  ;;  %v2255_v21 = vpop.f32.mrf.mxu0 }
 0x187   :  { %v2269_v54 = vpop.f32.mrf.mxu1  ;;  %v2295_v37 = vpop.f32.mrf.mxu3  ;;  %v2256_v38 = vadd.f32 %v2255_v21, %v430_v32  ;;  %v2282_v40 = vadd.f32 %v2281_v46, %v2268_v44  ;;  %v4759_v32 = vld [vmem:[#allocation11 + $0x30] sm:$0xff]  ;;  %v4756_v46 = vld [vmem:[#allocation11 + $0x18] sm:$0xff] }
 0x188   :  { %2974 = vmatpush.bf16.msra.mxu2 %v4759_v32  ;;  %v4755_v21 = vld [vmem:[#allocation11 + $0x10] sm:$0xff] }
 0x189   :  { %v2270_v63 = vadd.f32 %v2269_v54, %v2256_v38  ;;  %v2296_v57 = vadd.f32 %v2295_v37, %v2282_v40  ;;  %v4753_v54 = vld [vmem:[#allocation11] sm:$0xff] }
 0x18c   :  { %2975 = vmatpush.bf16.msra.mxu2 %v4758_v33 }
 0x18e   :  { %v2283_v41 = vpop.f32.mrf.mxu2 }
 0x18f   :  { %v2284_v6 = vadd.f32 %v2283_v41, %v2270_v63  ;;  %v2297_v29 = vpop.f32.mrf.mxu3  ;;  %v4775_v63 = vld [vmem:[#allocation10] ss:$0 sm:$0xff] }
 0x190   :  { %2976 = vmatpush.bf16.msra.mxu2 %v4757_v36 }
 0x191   :  { %v2298_v5 = vadd.f32 %v2297_v29, %v2284_v6 }
 0x194   :  { %2977 = vmatpush.bf16.msra.mxu2 %v4756_v46 }
 0x198   :  { %2978 = vmatpush.bf16.msra.mxu2 %v4755_v21 }
 0x19c   :  { %2979 = vmatpush.bf16.msra.mxu2 %v4754_v28 }
 0x19e   :  { %v2309_v34 = vpop.f32.mrf.mxu0 }
 0x19f   :  { %v2323_v47 = vpop.f32.mrf.mxu1  ;;  %v2310_v53 = vadd.f32 %v2309_v34, %v2296_v57 }
 0x1a0   :  { %2980 = vmatpush.bf16.msra.mxu2 %v4753_v54 }
 0x1a1   :  { %v2324_v0 = vadd.f32 %v2323_v47, %v2310_v53 }
 0x1a3   :  { %4793 = vtanh.f32 %v2324_v0 }
 0x1a6   :  { %v2311_v45 = vpop.f32.mrf.mxu0  ;;  %v2337_v56 = vpop.f32.mrf.mxu2 }
 0x1a7   :  { %v2312_v51 = vadd.f32 %v2311_v45, %v2298_v5  ;;  %v2325_v59 = vpop.f32.mrf.mxu1  ;;  %v2351_v58 = vpop.f32.mrf.mxu3  ;;  %v2338_v61 = vadd.f32 %v2337_v56, %v431_v60 }
 0x1a9   :  { %v2326_v52 = vadd.f32 %v2325_v59, %v2312_v51  ;;  %v4794_v31 = vpop.eup %4793  ;;  %v2352_v11 = vadd.f32 %v2351_v58, %v2338_v61 }
 0x1ab   :  { %4795 = vtanh.f32 %v2326_v52 }
 0x1ae   :  { %v2339_v1 = vpop.f32.mrf.mxu2 }
 0x1af   :  { %v2353_v2 = vpop.f32.mrf.mxu3  ;;  %v2340_v7 = vadd.f32 %v2339_v1, %v431_v60 }
 0x1b1   :  { %v4796_v35 = vpop.eup %4795  ;;  %v2354_v12 = vadd.f32 %v2353_v2, %v2340_v7 }
 0x1b2   :  { %v2428_v19 = vpack.c.bf16 %v4796_v35, %v4794_v31 }
 0x1b4   :  { %2882 = vmatmul.bf16.vlgmr.msra.gmra.mxu0 %v2428_v19  ;;  %v4776_v19 = vld [vmem:[#allocation13] ss:$0 sm:$0xff] }
 0x1be   :  { %v2365_v4 = vpop.f32.mrf.mxu0 }
 0x1bf   :  { %v2379_v49 = vpop.f32.mrf.mxu1  ;;  %v2366_v9 = vadd.f32 %v2365_v4, %v2352_v11 }
 0x1c1   :  { %v2380_v14 = vadd.f32 %v2379_v49, %v2366_v9 }
 0x1c6   :  { %v2393_v48 = vpop.f32.mrf.mxu2  ;;  %v2367_v13 = vpop.f32.mrf.mxu0 }
 0x1c7   :  { %v2407_v3 = vpop.f32.mrf.mxu3  ;;  %v2368_v15 = vadd.f32 %v2367_v13, %v2354_v12  ;;  %v2394_v16 = vadd.f32 %v2393_v48, %v2380_v14  ;;  %v2381_v17 = vpop.f32.mrf.mxu1 }
 0x1c9   :  { %v2382_v43 = vadd.f32 %v2381_v17, %v2368_v15  ;;  %v2408_v55 = vadd.f32 %v2407_v3, %v2394_v16 }
 0x1cb   :  { %4797 = vtanh.f32 %v2408_v55 }
 0x1ce   :  { %v2395_v26 = vpop.f32.mrf.mxu2 }
 0x1cf   :  { %v2396_v20 = vadd.f32 %v2395_v26, %v2382_v43  ;;  %v2409_v24 = vpop.f32.mrf.mxu3 }
 0x1d1   :  { %v2410_v18 = vadd.f32 %v2409_v24, %v2396_v20  ;;  %v4798_v8 = vpop.eup %4797 }
 0x1d3   :  { %4799 = vtanh.f32 %v2410_v18 }
 0x1d9   :  { %v4800_v30 = vpop.eup %4799 }
 0x1da   :  { %v2429_v25 = vpack.c.bf16 %v4800_v30, %v4798_v8 }
 0x1dc   :  { %2896 = vmatmul.bf16.vlgmr.msra.gmra.mxu1 %v2429_v25 }
 0x1de   :  { %v2827_v44 = vpop.f32.mrf.mxu0 }
 0x1df   :  { %v2841_v37 = vpop.f32.mrf.mxu1  ;;  %v2828_v34 = vadd.f32 %v4775_v63, %v2827_v44 }
 0x1e1   :  { %v2842_v47 = vadd.f32 %v2841_v37, %v2828_v34 }
 0x1e6   :  { %v2829_v38 = vpop.f32.mrf.mxu0  ;;  %v2855_v40 = vpop.f32.mrf.mxu2 }
 0x1e7   :  { %v2843_v41 = vpop.f32.mrf.mxu1  ;;  %v2830_v62 = vadd.f32 %v4775_v63, %v2829_v38  ;;  %v2856_v5 = vadd.f32 %v2855_v40, %v2842_v47 }
 0x1e9   :  { %v2844_v53 = vadd.f32 %v2843_v41, %v2830_v62 }
 0x1ee   :  { %v2857_v6 = vpop.f32.mrf.mxu2 }
 0x1ef   :  { %v2858_v0 = vadd.f32 %v2857_v6, %v2844_v53 }
 0x1ff   :  { %v2869_v42 = vpop.f32.mrf.mxu3 }
 0x200   :  { %v2870_v45 = vadd.f32 %v2869_v42, %v2856_v5 }
 0x207   :  { %v2871_v50 = vpop.f32.mrf.mxu3 }
 0x208   :  { %v2872_v59 = vadd.f32 %v2871_v50, %v2858_v0 }
 0x231   :  { %v2883_v57 = vpop.f32.mrf.mxu0 }
 0x232   :  { %v2884_v10 = vadd.f32 %v2883_v57, %v2870_v45 }
 0x239   :  { %v2885_v51 = vpop.f32.mrf.mxu0 }
 0x23a   :  { %v2886_v52 = vadd.f32 %v2885_v51, %v2872_v59 }
 0x259   :  { %v2897_v29 = vpop.f32.mrf.mxu1 }
 0x25a   :  { %v2898_v22 = vadd.f32 %v2897_v29, %v2884_v10 }
 0x25c   :  { %v2902_v56 = vmax.f32 %v2898_v22, 0.0 }
 0x261   :  { %v2899_v31 = vpop.f32.mrf.mxu1 }
 0x262   :  { %v2900_v23 = vadd.f32 %v2899_v31, %v2886_v52 }
 0x264   :  { %v2903_v35 = vmax.f32 %v2900_v23, 0.0 }
 0x266   :  { %v2904_v58 = vpack.c.bf16 %v2903_v35, %v2902_v56 }
 0x268   :  { %2981 = vmatmul.bf16.vlgmr.msra.gmra.mxu2 %v2904_v58 }
 0x2eb   :  { %v2982_v39 = vpop.f32.mrf.mxu2 }
 0x2ec   :  { %v2983_v60 = vadd.f32 %v4776_v19, %v2982_v39 }
 0x2ee   :  { %2987 = vst [vmem:[#allocation14] sm:$0xff] %v2983_v60 }
 0x2f3   :  { %v2984_v61 = vpop.f32.mrf.mxu2 }
 0x2f4   :  { %v2985_v1 = vadd.f32 %v4776_v19, %v2984_v61 }
 0x2f6   :  { %2988 = vst [vmem:[#allocation14 + $0x8] sm:$0xff] %v2985_v1 }
 0x2f7   :  { %3001 = dma.vmem_to_hbm [thread:$0]  %s2994_s6, 256, %s2996_s14, [#allocation4], %s5015_s15, %s5015_s15, %s5016_s1  }
 0x2f8   :  { %5001 = dma.done.wait [#allocation4], 256  }
 0x2f9   :  { %5002 = vsyncadd [#allocation4], 4294967040 }
 0x2fa   :  { %3006 = vsyncpa [#allocation3], 1 }
 0x2fb   :  { %3007 = vsyncpa [#allocation6], 1 }
 0x2fc   :  { %3008 = vsyncpa [#allocation9], 1 }
 0x2fd   :  { %3009 = vsyncpa [#allocation12], 1 }
 0x2fe   :  { %3010 = vsyncpa [#allocation4], 1 }

</bundles_post_ra>
